<compile_context>
chip_gen: v6e
topology: v6e:2x2x1
jax: 0.10.0
libtpu: 0.0.40
codegen_flags: <defaults>
</compile_context>

<pallas_src>
import math
import functools

import jax
import jax.numpy as jnp
from jax.experimental import pallas as pl
from jax.experimental.pallas import tpu as pltpu


# ---------------------------------------------------------------------------
# Pallas kernel: one grid step == (batch element, query tile), fully fused.
# ---------------------------------------------------------------------------
def _encoder_layer_kernel(xq_ref, xkv_ref, mask_ref,
                          ln1_g, ln1_b,
                          wq, bq, wk, bk, wv, bv, wo_h, bo,
                          ln2_g, ln2_b,
                          w1, b1, w2, b2,
                          out_ref,
                          k_scr, v_scr,
                          *, heads, apply_ln1):
    f32 = jnp.float32
    bf16 = jnp.bfloat16

    xq = xq_ref[0]                      # [tq, D] f32  (query tile / residual)
    mask = mask_ref[0]                  # [1,  T] f32  (1.0 == masked position)
    tq, D = xq.shape
    dh = D // heads
    scale = 1.0 / math.sqrt(dh)

    def layer_norm(v, g, b):            # f32 throughout, eps=1e-6 like PyTorch
        mu = jnp.mean(v, axis=-1, keepdims=True)
        var = jnp.mean((v - mu) ** 2, axis=-1, keepdims=True)
        return (v - mu) * jax.lax.rsqrt(var + 1e-6) * g + b

    # ---- K/V: compute once per batch element (query tile 0), keep in VMEM ---
    @pl.when(pl.program_id(1) == 0)
    def _():
        xkv = xkv_ref[0]                                     # [T, D] f32
        xkv_n = layer_norm(xkv, ln1_g[...], ln1_b[...]) if apply_ln1 else xkv
        xkv16 = xkv_n.astype(bf16)
        k = jnp.dot(xkv16, wk[...], preferred_element_type=f32) + bk[...]
        v = jnp.dot(xkv16, wv[...], preferred_element_type=f32) + bv[...]
        k_scr[...] = k.astype(bf16)
        v_scr[...] = v.astype(bf16)

    # ---- Q projection for this query tile ------------------------------------
    xq_n = layer_norm(xq, ln1_g[...], ln1_b[...]) if apply_ln1 else xq
    q = jnp.dot(xq_n.astype(bf16), wq[...], preferred_element_type=f32) + bq[...]
    q16 = (q * scale).astype(bf16)      # fold 1/sqrt(dh) into Q once

    k16 = k_scr[...]                    # [T, D] bf16 (resident across q tiles)
    v16 = v_scr[...]                    # [T, D] bf16

    # Additive mask bias, computed once (stays in f32: -1e18 must not be cast).
    bias = jnp.where(mask > 0.5, -1e18, 0.0)                 # [1, T] f32

    # ---- Multi-headed attention; accumulate output projection per head ------
    attn_out = jnp.zeros((tq, D), f32)
    for h in range(heads):                                   # static, heads small
        sl = slice(h * dh, (h + 1) * dh)
        qh = q16[:, sl]                                      # [tq, dh] bf16
        kh = k16[:, sl]                                      # [T,  dh] bf16
        vh = v16[:, sl]                                      # [T,  dh] bf16

        # scores = qh @ kh^T without materializing a transpose of kh
        scores = jax.lax.dot_general(
            qh, kh,
            dimension_numbers=(((1,), (1,)), ((), ())),
            preferred_element_type=f32)                      # [tq, T] f32
        scores = scores + bias

        m = jnp.max(scores, axis=-1, keepdims=True)
        p = jnp.exp(scores - m)
        denom = jnp.sum(p, axis=-1, keepdims=True)
        attn = p * pl.reciprocal(denom, approx=True)         # EUP, not VPU divide

        ctx_h = jnp.dot(attn.astype(bf16), vh,
                        preferred_element_type=f32)          # [tq, dh] f32
        # head-h rows of the output projection: ctx_h @ wo[h*dh:(h+1)*dh, :]
        attn_out = attn_out + jnp.dot(ctx_h.astype(bf16), wo_h[h],
                                      preferred_element_type=f32)
    attn_out = attn_out + bo[...]

    out = attn_out + xq            # dropout(context) + inputs  (dropout == id)

    # ---- Positionwise feed-forward ------------------------------------------
    on = layer_norm(out, ln2_g[...], ln2_b[...])
    inter = jnp.dot(on.astype(bf16), w1[...], preferred_element_type=f32) + b1[...]
    # gelu (tanh approximation, as used in PreSumm) — f32 elementwise
    inter = 0.5 * inter * (1.0 + jnp.tanh(math.sqrt(2.0 / math.pi)
                                          * (inter + 0.044715 * inter ** 3)))
    ff = jnp.dot(inter.astype(bf16), w2[...], preferred_element_type=f32) + b2[...]

    out_ref[0] = ff + out


_PARAM_ORDER = ("ln1_g", "ln1_b",
                "wq", "bq", "wk", "bk", "wv", "bv", "wo", "bo",
                "ln2_g", "ln2_b",
                "w1", "b1", "w2", "b2")


def _pick_q_tile(T):
    for cand in (512, 256, 128):
        if T % cand == 0:
            return cand
    return T


def transformer_encoder_layer(iter_idx, x, mask, params, *, heads, q_tile=None):
    """x: [B, T, D] f32, mask: [B, T] f32 (1.0 = masked). Returns [B, T, D] f32."""
    B, T, D = x.shape
    dh = D // heads
    tq = q_tile if q_tile is not None else _pick_q_tile(T)
    assert T % tq == 0, "sequence length must be divisible by the query tile"

    mask3 = mask.reshape(B, 1, T).astype(jnp.float32)

    # Weights are cast to bf16 on the host (halves resident VMEM, feeds the MXU
    # at its bf16 rate); biases and LayerNorm params stay f32.  wo is reshaped
    # to [heads, dh, D] so the kernel can accumulate per-head output projections.
    bf16 = jnp.bfloat16
    prepared = dict(params)
    for name in ("wq", "wk", "wv", "w1", "w2"):
        prepared[name] = params[name].astype(bf16)
    prepared["wo"] = params["wo"].astype(bf16).reshape(heads, dh, D)
    param_list = [prepared[name] for name in _PARAM_ORDER]

    kernel = functools.partial(_encoder_layer_kernel,
                               heads=heads,
                               apply_ln1=(iter_idx != 0))

    grid = (B, T // tq)
    in_specs = [
        pl.BlockSpec((1, tq, D), lambda b, qi: (b, qi, 0)),   # query tile / residual
        pl.BlockSpec((1, T, D), lambda b, qi: (b, 0, 0)),     # full sequence (K/V)
        pl.BlockSpec((1, 1, T), lambda b, qi: (b, 0, 0)),     # padding mask
    ] + [
        # constant block index -> fetched once, kept resident across grid steps
        pl.BlockSpec(p.shape, (lambda b, qi, n=p.ndim: (0,) * n))
        for p in param_list
    ]

    return pl.pallas_call(
        kernel,
        out_shape=jax.ShapeDtypeStruct((B, T, D), jnp.float32),
        grid_spec=pltpu.PrefetchScalarGridSpec(
            num_scalar_prefetch=0,
            grid=grid,
            in_specs=in_specs,
            out_specs=pl.BlockSpec((1, tq, D), lambda b, qi: (b, qi, 0)),
            scratch_shapes=[pltpu.VMEM((T, D), bf16),    # K (bf16), per-batch resident
                            pltpu.VMEM((T, D), bf16)]),  # V (bf16), per-batch resident
        compiler_params=pltpu.CompilerParams(
            # batch axis parallel (megacore / v7x 2-TC); query-tile axis is
            # sequential ("arbitrary") because it carries the K/V scratch.
            dimension_semantics=("parallel", "arbitrary"),
            vmem_limit_bytes=64 * 1024 * 1024),
    )(x, x, mask3, *param_list)


# ---------------------------------------------------------------------------
# Pure-JAX f32 reference (mirrors the PyTorch forward) for a sanity check.
# ---------------------------------------------------------------------------
def _reference(iter_idx, x, mask, params, *, heads):
    def ln(v, g, b):
        mu = jnp.mean(v, -1, keepdims=True)
        var = jnp.mean((v - mu) ** 2, -1, keepdims=True)
        return (v - mu) / jnp.sqrt(var + 1e-6) * g + b

    B, T, D = x.shape
    dh = D // heads
    xn = ln(x, params["ln1_g"], params["ln1_b"]) if iter_idx != 0 else x

    def proj(v, w, b):
        return v @ w + b

    q = proj(xn, params["wq"], params["bq"]).reshape(B, T, heads, dh).transpose(0, 2, 1, 3)
    k = proj(xn, params["wk"], params["bk"]).reshape(B, T, heads, dh).transpose(0, 2, 1, 3)
    v = proj(xn, params["wv"], params["bv"]).reshape(B, T, heads, dh).transpose(0, 2, 1, 3)
    q = q / math.sqrt(dh)
    scores = jnp.einsum("bhqd,bhkd->bhqk", q, k)
    m = (mask.reshape(B, 1, 1, T) > 0.5)
    scores = jnp.where(m, -1e18, scores)
    attn = jax.nn.softmax(scores, axis=-1)
    ctx = jnp.einsum("bhqk,bhkd->bhqd", attn, v).transpose(0, 2, 1, 3).reshape(B, T, D)
    attn_out = proj(ctx, params["wo"], params["bo"])
    out = attn_out + x

    on = ln(out, params["ln2_g"], params["ln2_b"])
    inter = proj(on, params["w1"], params["b1"])
    inter = 0.5 * inter * (1.0 + jnp.tanh(math.sqrt(2.0 / math.pi)
                                          * (inter + 0.044715 * inter ** 3)))
    ff = proj(inter, params["w2"], params["b2"])
    return ff + out


# ---------------------------------------------------------------------------
def _init_params(key, d_model, d_ff):
    ks = jax.random.split(key, 12)
    s = 0.05
    return {
        "ln1_g": jnp.ones((1, d_model), jnp.float32),
        "ln1_b": jnp.zeros((1, d_model), jnp.float32),
        "wq": s * jax.random.normal(ks[0], (d_model, d_model), jnp.float32),
        "bq": s * jax.random.normal(ks[1], (1, d_model), jnp.float32),
        "wk": s * jax.random.normal(ks[2], (d_model, d_model), jnp.float32),
        "bk": s * jax.random.normal(ks[3], (1, d_model), jnp.float32),
        "wv": s * jax.random.normal(ks[4], (d_model, d_model), jnp.float32),
        "bv": s * jax.random.normal(ks[5], (1, d_model), jnp.float32),
        "wo": s * jax.random.normal(ks[6], (d_model, d_model), jnp.float32),
        "bo": s * jax.random.normal(ks[7], (1, d_model), jnp.float32),
        "ln2_g": jnp.ones((1, d_model), jnp.float32),
        "ln2_b": jnp.zeros((1, d_model), jnp.float32),
        "w1": s * jax.random.normal(ks[8], (d_model, d_ff), jnp.float32),
        "b1": s * jax.random.normal(ks[9], (1, d_ff), jnp.float32),
        "w2": s * jax.random.normal(ks[10], (d_ff, d_model), jnp.float32),
        "b2": s * jax.random.normal(ks[11], (1, d_model), jnp.float32),
    }


if __name__ == "__main__":
    B, T, D, H, F = 2, 8, 32, 4, 64
    key = jax.random.PRNGKey(0)
    kx, kp = jax.random.split(key)

    x = jax.random.normal(kx, (B, T, D), jnp.float32)
    # mask: 1.0 = padded/masked position; mask the last two tokens of batch 1
    mask = jnp.zeros((B, T), jnp.float32).at[1, -2:].set(1.0)
    params = _init_params(kp, D, F)

    # Tolerance is vs. the pure-f32 reference: the kernel runs its matmuls with
    # bf16 operands (f32 accumulation), so exact f32 agreement is not expected.
    for iter_idx in (0, 1):
        out = transformer_encoder_layer(iter_idx, x, mask, params, heads=H)
        out = jax.block_until_ready(out)
        ref = _reference(iter_idx, x, mask, params, heads=H)
        assert out.shape == (B, T, D)
        assert jnp.allclose(out, ref, rtol=3e-2, atol=3e-2), \
            f"mismatch vs. JAX reference (iter={iter_idx})"

    print("KERNEL_OK")
</pallas_src>

<mosaic_0001>
module attributes {stable_mosaic.version = 11 : i64} {
  func.func @_encoder_layer_kernel(%arg0: i32, %arg1: i32, %arg2: memref<1x8x32xf32, #tpu.memory_space<vmem>>, %arg3: memref<1x8x32xf32, #tpu.memory_space<vmem>>, %arg4: memref<1x1x8xf32, #tpu.memory_space<vmem>>, %arg5: memref<1x32xf32, #tpu.memory_space<vmem>>, %arg6: memref<1x32xf32, #tpu.memory_space<vmem>>, %arg7: memref<32x32xbf16, #tpu.memory_space<vmem>>, %arg8: memref<1x32xf32, #tpu.memory_space<vmem>>, %arg9: memref<32x32xbf16, #tpu.memory_space<vmem>>, %arg10: memref<1x32xf32, #tpu.memory_space<vmem>>, %arg11: memref<32x32xbf16, #tpu.memory_space<vmem>>, %arg12: memref<1x32xf32, #tpu.memory_space<vmem>>, %arg13: memref<4x8x32xbf16, #tpu.memory_space<vmem>>, %arg14: memref<1x32xf32, #tpu.memory_space<vmem>>, %arg15: memref<1x32xf32, #tpu.memory_space<vmem>>, %arg16: memref<1x32xf32, #tpu.memory_space<vmem>>, %arg17: memref<32x64xbf16, #tpu.memory_space<vmem>>, %arg18: memref<1x64xf32, #tpu.memory_space<vmem>>, %arg19: memref<64x32xbf16, #tpu.memory_space<vmem>>, %arg20: memref<1x32xf32, #tpu.memory_space<vmem>>, %arg21: memref<1x8x32xf32, #tpu.memory_space<vmem>>, %arg22: memref<8x32xbf16, #tpu.memory_space<vmem>>, %arg23: memref<8x32xbf16, #tpu.memory_space<vmem>>) attributes {dimension_semantics = [#tpu.dimension_semantics<parallel>, #tpu.dimension_semantics<arbitrary>], iteration_bounds = array<i64: 2, 1>, scalar_prefetch = 0 : i64, scratch_operands = 2 : i64, tpu.core_type = #tpu.core_type<tc>, window_params = [{transform_indices = @transform_0, window_bounds = array<i64: 1, 8, 32>}, {transform_indices = @transform_1, window_bounds = array<i64: 1, 8, 32>}, {transform_indices = @transform_2, window_bounds = array<i64: 1, 1, 8>}, {pipeline_mode = #tpu.pipeline_mode<synchronous>, transform_indices = @transform_3, window_bounds = array<i64: 1, 32>}, {pipeline_mode = #tpu.pipeline_mode<synchronous>, transform_indices = @transform_4, window_bounds = array<i64: 1, 32>}, {pipeline_mode = #tpu.pipeline_mode<synchronous>, transform_indices = @transform_5, window_bounds = array<i64: 32, 32>}, {pipeline_mode = #tpu.pipeline_mode<synchronous>, transform_indices = @transform_6, window_bounds = array<i64: 1, 32>}, {pipeline_mode = #tpu.pipeline_mode<synchronous>, transform_indices = @transform_7, window_bounds = array<i64: 32, 32>}, {pipeline_mode = #tpu.pipeline_mode<synchronous>, transform_indices = @transform_8, window_bounds = array<i64: 1, 32>}, {pipeline_mode = #tpu.pipeline_mode<synchronous>, transform_indices = @transform_9, window_bounds = array<i64: 32, 32>}, {pipeline_mode = #tpu.pipeline_mode<synchronous>, transform_indices = @transform_10, window_bounds = array<i64: 1, 32>}, {pipeline_mode = #tpu.pipeline_mode<synchronous>, transform_indices = @transform_11, window_bounds = array<i64: 4, 8, 32>}, {pipeline_mode = #tpu.pipeline_mode<synchronous>, transform_indices = @transform_12, window_bounds = array<i64: 1, 32>}, {pipeline_mode = #tpu.pipeline_mode<synchronous>, transform_indices = @transform_13, window_bounds = array<i64: 1, 32>}, {pipeline_mode = #tpu.pipeline_mode<synchronous>, transform_indices = @transform_14, window_bounds = array<i64: 1, 32>}, {pipeline_mode = #tpu.pipeline_mode<synchronous>, transform_indices = @transform_15, window_bounds = array<i64: 32, 64>}, {pipeline_mode = #tpu.pipeline_mode<synchronous>, transform_indices = @transform_16, window_bounds = array<i64: 1, 64>}, {pipeline_mode = #tpu.pipeline_mode<synchronous>, transform_indices = @transform_17, window_bounds = array<i64: 64, 32>}, {pipeline_mode = #tpu.pipeline_mode<synchronous>, transform_indices = @transform_18, window_bounds = array<i64: 1, 32>}, {transform_indices = @transform_19, window_bounds = array<i64: 1, 8, 32>}]} {
    %c0 = arith.constant 0 : index
    %c0_0 = arith.constant 0 : index
    %c0_1 = arith.constant 0 : index
    %0 = vector.load %arg2[%c0, %c0_0, %c0_1] : memref<1x8x32xf32, #tpu.memory_space<vmem>>, vector<1x8x32xf32>
    %1 = vector.shape_cast %0 : vector<1x8x32xf32> to vector<8x32xf32>
    %c0_2 = arith.constant 0 : index
    %c0_3 = arith.constant 0 : index
    %c0_4 = arith.constant 0 : index
    %2 = vector.load %arg4[%c0_2, %c0_3, %c0_4] : memref<1x1x8xf32, #tpu.memory_space<vmem>>, vector<1x1x8xf32>
    %3 = vector.shape_cast %2 : vector<1x1x8xf32> to vector<1x8xf32>
    %c0_i32 = arith.constant 0 : i32
    %4 = arith.cmpi eq, %arg1, %c0_i32 : i32
    %5 = arith.extui %4 : i1 to i32
    %c0_i32_5 = arith.constant 0 : i32
    %6 = arith.cmpi ne, %5, %c0_i32_5 : i32
    scf.if %6 {
      %c0_76 = arith.constant 0 : index
      %c0_77 = arith.constant 0 : index
      %c0_78 = arith.constant 0 : index
      %173 = vector.load %arg3[%c0_76, %c0_77, %c0_78] : memref<1x8x32xf32, #tpu.memory_space<vmem>>, vector<1x8x32xf32>
      %174 = vector.shape_cast %173 : vector<1x8x32xf32> to vector<8x32xf32>
      %175 = arith.truncf %174 : vector<8x32xf32> to vector<8x32xbf16>
      %c0_79 = arith.constant 0 : index
      %c0_80 = arith.constant 0 : index
      %176 = vector.load %arg9[%c0_79, %c0_80] : memref<32x32xbf16, #tpu.memory_space<vmem>>, vector<32x32xbf16>
      %cst_81 = arith.constant dense<0.000000e+00> : vector<8x32xf32>
      %177 = tpu.matmul %175, %176, %cst_81 {dimension_numbers = #tpu.dot_dimension_numbers<[1], [0], [0], [1], [0, 0, 1, 1], [], []>} : vector<8x32xbf16>, vector<32x32xbf16>, vector<8x32xf32> -> vector<8x32xf32>
      %c0_82 = arith.constant 0 : index
      %c0_83 = arith.constant 0 : index
      %178 = vector.load %arg10[%c0_82, %c0_83] : memref<1x32xf32, #tpu.memory_space<vmem>>, vector<1x32xf32>
      %179 = vector.broadcast %178 : vector<1x32xf32> to vector<8x32xf32>
      %180 = arith.addf %177, %179 : vector<8x32xf32>
      %c0_84 = arith.constant 0 : index
      %c0_85 = arith.constant 0 : index
      %181 = vector.load %arg11[%c0_84, %c0_85] : memref<32x32xbf16, #tpu.memory_space<vmem>>, vector<32x32xbf16>
      %cst_86 = arith.constant dense<0.000000e+00> : vector<8x32xf32>
      %182 = tpu.matmul %175, %181, %cst_86 {dimension_numbers = #tpu.dot_dimension_numbers<[1], [0], [0], [1], [0, 0, 1, 1], [], []>} : vector<8x32xbf16>, vector<32x32xbf16>, vector<8x32xf32> -> vector<8x32xf32>
      %c0_87 = arith.constant 0 : index
      %c0_88 = arith.constant 0 : index
      %183 = vector.load %arg12[%c0_87, %c0_88] : memref<1x32xf32, #tpu.memory_space<vmem>>, vector<1x32xf32>
      %184 = vector.broadcast %183 : vector<1x32xf32> to vector<8x32xf32>
      %185 = arith.addf %182, %184 : vector<8x32xf32>
      %186 = arith.truncf %180 : vector<8x32xf32> to vector<8x32xbf16>
      %c0_89 = arith.constant 0 : index
      %c0_90 = arith.constant 0 : index
      %187 = vector.load %arg22[%c0_89, %c0_90] : memref<8x32xbf16, #tpu.memory_space<vmem>>, vector<8x32xbf16>
      tpu.vector_store %arg22[%c0_89, %c0_90], %186 {strides = array<i32>} : memref<8x32xbf16, #tpu.memory_space<vmem>>, vector<8x32xbf16>,
      %188 = arith.truncf %185 : vector<8x32xf32> to vector<8x32xbf16>
      %c0_91 = arith.constant 0 : index
      %c0_92 = arith.constant 0 : index
      %189 = vector.load %arg23[%c0_91, %c0_92] : memref<8x32xbf16, #tpu.memory_space<vmem>>, vector<8x32xbf16>
      tpu.vector_store %arg23[%c0_91, %c0_92], %188 {strides = array<i32>} : memref<8x32xbf16, #tpu.memory_space<vmem>>, vector<8x32xbf16>,
    } else {
    }
    %7 = arith.truncf %1 : vector<8x32xf32> to vector<8x32xbf16>
    %c0_6 = arith.constant 0 : index
    %c0_7 = arith.constant 0 : index
    %8 = vector.load %arg7[%c0_6, %c0_7] : memref<32x32xbf16, #tpu.memory_space<vmem>>, vector<32x32xbf16>
    %cst = arith.constant dense<0.000000e+00> : vector<8x32xf32>
    %9 = tpu.matmul %7, %8, %cst {dimension_numbers = #tpu.dot_dimension_numbers<[1], [0], [0], [1], [0, 0, 1, 1], [], []>} : vector<8x32xbf16>, vector<32x32xbf16>, vector<8x32xf32> -> vector<8x32xf32>
    %c0_8 = arith.constant 0 : index
    %c0_9 = arith.constant 0 : index
    %10 = vector.load %arg8[%c0_8, %c0_9] : memref<1x32xf32, #tpu.memory_space<vmem>>, vector<1x32xf32>
    %11 = vector.broadcast %10 : vector<1x32xf32> to vector<8x32xf32>
    %12 = arith.addf %9, %11 : vector<8x32xf32>
    %cst_10 = arith.constant 0.353553385 : f32
    %13 = vector.broadcast %cst_10 : f32 to vector<8x32xf32>
    %14 = arith.mulf %12, %13 : vector<8x32xf32>
    %15 = arith.truncf %14 : vector<8x32xf32> to vector<8x32xbf16>
    %c0_11 = arith.constant 0 : index
    %c0_12 = arith.constant 0 : index
    %16 = vector.load %arg22[%c0_11, %c0_12] : memref<8x32xbf16, #tpu.memory_space<vmem>>, vector<8x32xbf16>
    %c0_13 = arith.constant 0 : index
    %c0_14 = arith.constant 0 : index
    %17 = vector.load %arg23[%c0_13, %c0_14] : memref<8x32xbf16, #tpu.memory_space<vmem>>, vector<8x32xbf16>
    %cst_15 = arith.constant 5.000000e-01 : f32
    %18 = vector.broadcast %cst_15 : f32 to vector<1x8xf32>
    %19 = arith.cmpf ogt, %3, %18 : vector<1x8xf32>
    %cst_16 = arith.constant -9.99999984E+17 : f32
    %cst_17 = arith.constant 0.000000e+00 : f32
    %20 = vector.broadcast %cst_16 : f32 to vector<1x8xf32>
    %21 = vector.broadcast %cst_17 : f32 to vector<1x8xf32>
    %22 = arith.select %19, %20, %21 : vector<1x8xi1>, vector<1x8xf32>
    %cst_18 = arith.constant 0.000000e+00 : f32
    %23 = vector.broadcast %cst_18 : f32 to vector<8x32xf32>
    %24 = vector.extract_strided_slice %15 {offsets = [0, 0], sizes = [8, 8], strides = [1, 1]} : vector<8x32xbf16> to vector<8x8xbf16>
    %25 = vector.extract_strided_slice %16 {offsets = [0, 0], sizes = [8, 8], strides = [1, 1]} : vector<8x32xbf16> to vector<8x8xbf16>
    %26 = vector.extract_strided_slice %17 {offsets = [0, 0], sizes = [8, 8], strides = [1, 1]} : vector<8x32xbf16> to vector<8x8xbf16>
    %cst_19 = arith.constant dense<0.000000e+00> : vector<8x8xf32>
    %27 = tpu.matmul %24, %25, %cst_19 {dimension_numbers = #tpu.dot_dimension_numbers<[1], [1], [0], [0], [0, 0, 1, 0], [], []>} : vector<8x8xbf16>, vector<8x8xbf16>, vector<8x8xf32> -> vector<8x8xf32>
    %28 = vector.broadcast %22 : vector<1x8xf32> to vector<8x8xf32>
    %29 = arith.addf %27, %28 : vector<8x8xf32>
    %cst_20 = arith.constant dense<0xFF800000> : vector<8xf32>
    %30 = vector.multi_reduction <maximumf>, %29, %cst_20 [1] : vector<8x8xf32> to vector<8xf32>
    %31 = vector.shape_cast %30 : vector<8xf32> to vector<8x1xf32>
    %32 = vector.broadcast %31 : vector<8x1xf32> to vector<8x8xf32>
    %33 = arith.subf %29, %32 : vector<8x8xf32>
    %34 = math.exp %33 : vector<8x8xf32>
    %cst_21 = arith.constant dense<0.000000e+00> : vector<8xf32>
    %35 = vector.multi_reduction <add>, %34, %cst_21 [1] : vector<8x8xf32> to vector<8xf32>
    %36 = vector.shape_cast %35 : vector<8xf32> to vector<8x1xf32>
    %37 = tpu.reciprocal %36 {approx = true} : vector<8x1xf32> -> vector<8x1xf32>
    %38 = vector.broadcast %37 : vector<8x1xf32> to vector<8x8xf32>
    %39 = arith.mulf %34, %38 : vector<8x8xf32>
    %40 = arith.truncf %39 : vector<8x8xf32> to vector<8x8xbf16>
    %cst_22 = arith.constant dense<0.000000e+00> : vector<8x8xf32>
    %41 = tpu.matmul %40, %26, %cst_22 {dimension_numbers = #tpu.dot_dimension_numbers<[1], [0], [0], [1], [0, 0, 1, 1], [], []>} : vector<8x8xbf16>, vector<8x8xbf16>, vector<8x8xf32> -> vector<8x8xf32>
    %42 = arith.truncf %41 : vector<8x8xf32> to vector<8x8xbf16>
    %c0_23 = arith.constant 0 : index
    %c0_24 = arith.constant 0 : index
    %c0_25 = arith.constant 0 : index
    %43 = vector.load %arg13[%c0_23, %c0_24, %c0_25] : memref<4x8x32xbf16, #tpu.memory_space<vmem>>, vector<1x8x32xbf16>
    %44 = vector.shape_cast %43 : vector<1x8x32xbf16> to vector<8x32xbf16>
    %cst_26 = arith.constant dense<0.000000e+00> : vector<8x32xf32>
    %45 = tpu.matmul %42, %44, %cst_26 {dimension_numbers = #tpu.dot_dimension_numbers<[1], [0], [0], [1], [0, 0, 1, 1], [], []>} : vector<8x8xbf16>, vector<8x32xbf16>, vector<8x32xf32> -> vector<8x32xf32>
    %46 = arith.addf %23, %45 : vector<8x32xf32>
    %47 = vector.extract_strided_slice %15 {offsets = [0, 8], sizes = [8, 8], strides = [1, 1]} : vector<8x32xbf16> to vector<8x8xbf16>
    %48 = vector.extract_strided_slice %16 {offsets = [0, 8], sizes = [8, 8], strides = [1, 1]} : vector<8x32xbf16> to vector<8x8xbf16>
    %49 = vector.extract_strided_slice %17 {offsets = [0, 8], sizes = [8, 8], strides = [1, 1]} : vector<8x32xbf16> to vector<8x8xbf16>
    %cst_27 = arith.constant dense<0.000000e+00> : vector<8x8xf32>
    %50 = tpu.matmul %47, %48, %cst_27 {dimension_numbers = #tpu.dot_dimension_numbers<[1], [1], [0], [0], [0, 0, 1, 0], [], []>} : vector<8x8xbf16>, vector<8x8xbf16>, vector<8x8xf32> -> vector<8x8xf32>
    %51 = vector.broadcast %22 : vector<1x8xf32> to vector<8x8xf32>
    %52 = arith.addf %50, %51 : vector<8x8xf32>
    %cst_28 = arith.constant dense<0xFF800000> : vector<8xf32>
    %53 = vector.multi_reduction <maximumf>, %52, %cst_28 [1] : vector<8x8xf32> to vector<8xf32>
    %54 = vector.shape_cast %53 : vector<8xf32> to vector<8x1xf32>
    %55 = vector.broadcast %54 : vector<8x1xf32> to vector<8x8xf32>
    %56 = arith.subf %52, %55 : vector<8x8xf32>
    %57 = math.exp %56 : vector<8x8xf32>
    %cst_29 = arith.constant dense<0.000000e+00> : vector<8xf32>
    %58 = vector.multi_reduction <add>, %57, %cst_29 [1] : vector<8x8xf32> to vector<8xf32>
    %59 = vector.shape_cast %58 : vector<8xf32> to vector<8x1xf32>
    %60 = tpu.reciprocal %59 {approx = true} : vector<8x1xf32> -> vector<8x1xf32>
    %61 = vector.broadcast %60 : vector<8x1xf32> to vector<8x8xf32>
    %62 = arith.mulf %57, %61 : vector<8x8xf32>
    %63 = arith.truncf %62 : vector<8x8xf32> to vector<8x8xbf16>
    %cst_30 = arith.constant dense<0.000000e+00> : vector<8x8xf32>
    %64 = tpu.matmul %63, %49, %cst_30 {dimension_numbers = #tpu.dot_dimension_numbers<[1], [0], [0], [1], [0, 0, 1, 1], [], []>} : vector<8x8xbf16>, vector<8x8xbf16>, vector<8x8xf32> -> vector<8x8xf32>
    %65 = arith.truncf %64 : vector<8x8xf32> to vector<8x8xbf16>
    %c1 = arith.constant 1 : index
    %c0_31 = arith.constant 0 : index
    %c0_32 = arith.constant 0 : index
    %66 = vector.load %arg13[%c1, %c0_31, %c0_32] : memref<4x8x32xbf16, #tpu.memory_space<vmem>>, vector<1x8x32xbf16>
    %67 = vector.shape_cast %66 : vector<1x8x32xbf16> to vector<8x32xbf16>
    %cst_33 = arith.constant dense<0.000000e+00> : vector<8x32xf32>
    %68 = tpu.matmul %65, %67, %cst_33 {dimension_numbers = #tpu.dot_dimension_numbers<[1], [0], [0], [1], [0, 0, 1, 1], [], []>} : vector<8x8xbf16>, vector<8x32xbf16>, vector<8x32xf32> -> vector<8x32xf32>
    %69 = arith.addf %46, %68 : vector<8x32xf32>
    %70 = vector.extract_strided_slice %15 {offsets = [0, 16], sizes = [8, 8], strides = [1, 1]} : vector<8x32xbf16> to vector<8x8xbf16>
    %71 = vector.extract_strided_slice %16 {offsets = [0, 16], sizes = [8, 8], strides = [1, 1]} : vector<8x32xbf16> to vector<8x8xbf16>
    %72 = vector.extract_strided_slice %17 {offsets = [0, 16], sizes = [8, 8], strides = [1, 1]} : vector<8x32xbf16> to vector<8x8xbf16>
    %cst_34 = arith.constant dense<0.000000e+00> : vector<8x8xf32>
    %73 = tpu.matmul %70, %71, %cst_34 {dimension_numbers = #tpu.dot_dimension_numbers<[1], [1], [0], [0], [0, 0, 1, 0], [], []>} : vector<8x8xbf16>, vector<8x8xbf16>, vector<8x8xf32> -> vector<8x8xf32>
    %74 = vector.broadcast %22 : vector<1x8xf32> to vector<8x8xf32>
    %75 = arith.addf %73, %74 : vector<8x8xf32>
    %cst_35 = arith.constant dense<0xFF800000> : vector<8xf32>
    %76 = vector.multi_reduction <maximumf>, %75, %cst_35 [1] : vector<8x8xf32> to vector<8xf32>
    %77 = vector.shape_cast %76 : vector<8xf32> to vector<8x1xf32>
    %78 = vector.broadcast %77 : vector<8x1xf32> to vector<8x8xf32>
    %79 = arith.subf %75, %78 : vector<8x8xf32>
    %80 = math.exp %79 : vector<8x8xf32>
    %cst_36 = arith.constant dense<0.000000e+00> : vector<8xf32>
    %81 = vector.multi_reduction <add>, %80, %cst_36 [1] : vector<8x8xf32> to vector<8xf32>
    %82 = vector.shape_cast %81 : vector<8xf32> to vector<8x1xf32>
    %83 = tpu.reciprocal %82 {approx = true} : vector<8x1xf32> -> vector<8x1xf32>
    %84 = vector.broadcast %83 : vector<8x1xf32> to vector<8x8xf32>
    %85 = arith.mulf %80, %84 : vector<8x8xf32>
    %86 = arith.truncf %85 : vector<8x8xf32> to vector<8x8xbf16>
    %cst_37 = arith.constant dense<0.000000e+00> : vector<8x8xf32>
    %87 = tpu.matmul %86, %72, %cst_37 {dimension_numbers = #tpu.dot_dimension_numbers<[1], [0], [0], [1], [0, 0, 1, 1], [], []>} : vector<8x8xbf16>, vector<8x8xbf16>, vector<8x8xf32> -> vector<8x8xf32>
    %88 = arith.truncf %87 : vector<8x8xf32> to vector<8x8xbf16>
    %c2 = arith.constant 2 : index
    %c0_38 = arith.constant 0 : index
    %c0_39 = arith.constant 0 : index
    %89 = vector.load %arg13[%c2, %c0_38, %c0_39] : memref<4x8x32xbf16, #tpu.memory_space<vmem>>, vector<1x8x32xbf16>
    %90 = vector.shape_cast %89 : vector<1x8x32xbf16> to vector<8x32xbf16>
    %cst_40 = arith.constant dense<0.000000e+00> : vector<8x32xf32>
    %91 = tpu.matmul %88, %90, %cst_40 {dimension_numbers = #tpu.dot_dimension_numbers<[1], [0], [0], [1], [0, 0, 1, 1], [], []>} : vector<8x8xbf16>, vector<8x32xbf16>, vector<8x32xf32> -> vector<8x32xf32>
    %92 = arith.addf %69, %91 : vector<8x32xf32>
    %93 = vector.extract_strided_slice %15 {offsets = [0, 24], sizes = [8, 8], strides = [1, 1]} : vector<8x32xbf16> to vector<8x8xbf16>
    %94 = vector.extract_strided_slice %16 {offsets = [0, 24], sizes = [8, 8], strides = [1, 1]} : vector<8x32xbf16> to vector<8x8xbf16>
    %95 = vector.extract_strided_slice %17 {offsets = [0, 24], sizes = [8, 8], strides = [1, 1]} : vector<8x32xbf16> to vector<8x8xbf16>
    %cst_41 = arith.constant dense<0.000000e+00> : vector<8x8xf32>
    %96 = tpu.matmul %93, %94, %cst_41 {dimension_numbers = #tpu.dot_dimension_numbers<[1], [1], [0], [0], [0, 0, 1, 0], [], []>} : vector<8x8xbf16>, vector<8x8xbf16>, vector<8x8xf32> -> vector<8x8xf32>
    %97 = vector.broadcast %22 : vector<1x8xf32> to vector<8x8xf32>
    %98 = arith.addf %96, %97 : vector<8x8xf32>
    %cst_42 = arith.constant dense<0xFF800000> : vector<8xf32>
    %99 = vector.multi_reduction <maximumf>, %98, %cst_42 [1] : vector<8x8xf32> to vector<8xf32>
    %100 = vector.shape_cast %99 : vector<8xf32> to vector<8x1xf32>
    %101 = vector.broadcast %100 : vector<8x1xf32> to vector<8x8xf32>
    %102 = arith.subf %98, %101 : vector<8x8xf32>
    %103 = math.exp %102 : vector<8x8xf32>
    %cst_43 = arith.constant dense<0.000000e+00> : vector<8xf32>
    %104 = vector.multi_reduction <add>, %103, %cst_43 [1] : vector<8x8xf32> to vector<8xf32>
    %105 = vector.shape_cast %104 : vector<8xf32> to vector<8x1xf32>
    %106 = tpu.reciprocal %105 {approx = true} : vector<8x1xf32> -> vector<8x1xf32>
    %107 = vector.broadcast %106 : vector<8x1xf32> to vector<8x8xf32>
    %108 = arith.mulf %103, %107 : vector<8x8xf32>
    %109 = arith.truncf %108 : vector<8x8xf32> to vector<8x8xbf16>
    %cst_44 = arith.constant dense<0.000000e+00> : vector<8x8xf32>
    %110 = tpu.matmul %109, %95, %cst_44 {dimension_numbers = #tpu.dot_dimension_numbers<[1], [0], [0], [1], [0, 0, 1, 1], [], []>} : vector<8x8xbf16>, vector<8x8xbf16>, vector<8x8xf32> -> vector<8x8xf32>
    %111 = arith.truncf %110 : vector<8x8xf32> to vector<8x8xbf16>
    %c3 = arith.constant 3 : index
    %c0_45 = arith.constant 0 : index
    %c0_46 = arith.constant 0 : index
    %112 = vector.load %arg13[%c3, %c0_45, %c0_46] : memref<4x8x32xbf16, #tpu.memory_space<vmem>>, vector<1x8x32xbf16>
    %113 = vector.shape_cast %112 : vector<1x8x32xbf16> to vector<8x32xbf16>
    %cst_47 = arith.constant dense<0.000000e+00> : vector<8x32xf32>
    %114 = tpu.matmul %111, %113, %cst_47 {dimension_numbers = #tpu.dot_dimension_numbers<[1], [0], [0], [1], [0, 0, 1, 1], [], []>} : vector<8x8xbf16>, vector<8x32xbf16>, vector<8x32xf32> -> vector<8x32xf32>
    %115 = arith.addf %92, %114 : vector<8x32xf32>
    %c0_48 = arith.constant 0 : index
    %c0_49 = arith.constant 0 : index
    %116 = vector.load %arg14[%c0_48, %c0_49] : memref<1x32xf32, #tpu.memory_space<vmem>>, vector<1x32xf32>
    %117 = vector.broadcast %116 : vector<1x32xf32> to vector<8x32xf32>
    %118 = arith.addf %115, %117 : vector<8x32xf32>
    %119 = arith.addf %118, %1 : vector<8x32xf32>
    %c0_50 = arith.constant 0 : index
    %c0_51 = arith.constant 0 : index
    %120 = vector.load %arg15[%c0_50, %c0_51] : memref<1x32xf32, #tpu.memory_space<vmem>>, vector<1x32xf32>
    %c0_52 = arith.constant 0 : index
    %c0_53 = arith.constant 0 : index
    %121 = vector.load %arg16[%c0_52, %c0_53] : memref<1x32xf32, #tpu.memory_space<vmem>>, vector<1x32xf32>
    %cst_54 = arith.constant dense<0.000000e+00> : vector<8xf32>
    %122 = vector.multi_reduction <add>, %119, %cst_54 [1] : vector<8x32xf32> to vector<8xf32>
    %123 = vector.shape_cast %122 : vector<8xf32> to vector<8x1xf32>
    %cst_55 = arith.constant 3.200000e+01 : f32
    %124 = vector.broadcast %cst_55 : f32 to vector<8x1xf32>
    %125 = arith.divf %123, %124 : vector<8x1xf32>
    %126 = vector.broadcast %125 : vector<8x1xf32> to vector<8x32xf32>
    %127 = arith.subf %119, %126 : vector<8x32xf32>
    %128 = arith.mulf %127, %127 : vector<8x32xf32>
    %cst_56 = arith.constant dense<0.000000e+00> : vector<8xf32>
    %129 = vector.multi_reduction <add>, %128, %cst_56 [1] : vector<8x32xf32> to vector<8xf32>
    %130 = vector.shape_cast %129 : vector<8xf32> to vector<8x1xf32>
    %cst_57 = arith.constant 3.200000e+01 : f32
    %131 = vector.broadcast %cst_57 : f32 to vector<8x1xf32>
    %132 = arith.divf %130, %131 : vector<8x1xf32>
    %133 = vector.broadcast %125 : vector<8x1xf32> to vector<8x32xf32>
    %134 = arith.subf %119, %133 : vector<8x32xf32>
    %cst_58 = arith.constant 9.99999997E-7 : f32
    %135 = vector.broadcast %cst_58 : f32 to vector<8x1xf32>
    %136 = arith.addf %132, %135 : vector<8x1xf32>
    %137 = math.rsqrt %136 : vector<8x1xf32>
    %138 = vector.broadcast %137 : vector<8x1xf32> to vector<8x32xf32>
    %139 = arith.mulf %134, %138 : vector<8x32xf32>
    %140 = vector.broadcast %120 : vector<1x32xf32> to vector<8x32xf32>
    %141 = arith.mulf %139, %140 : vector<8x32xf32>
    %142 = vector.broadcast %121 : vector<1x32xf32> to vector<8x32xf32>
    %143 = arith.addf %141, %142 : vector<8x32xf32>
    %144 = arith.truncf %143 : vector<8x32xf32> to vector<8x32xbf16>
    %c0_59 = arith.constant 0 : index
    %c0_60 = arith.constant 0 : index
    %145 = vector.load %arg17[%c0_59, %c0_60] : memref<32x64xbf16, #tpu.memory_space<vmem>>, vector<32x64xbf16>
    %cst_61 = arith.constant dense<0.000000e+00> : vector<8x64xf32>
    %146 = tpu.matmul %144, %145, %cst_61 {dimension_numbers = #tpu.dot_dimension_numbers<[1], [0], [0], [1], [0, 0, 1, 1], [], []>} : vector<8x32xbf16>, vector<32x64xbf16>, vector<8x64xf32> -> vector<8x64xf32>
    %c0_62 = arith.constant 0 : index
    %c0_63 = arith.constant 0 : index
    %147 = vector.load %arg18[%c0_62, %c0_63] : memref<1x64xf32, #tpu.memory_space<vmem>>, vector<1x64xf32>
    %148 = vector.broadcast %147 : vector<1x64xf32> to vector<8x64xf32>
    %149 = arith.addf %146, %148 : vector<8x64xf32>
    %cst_64 = arith.constant 5.000000e-01 : f32
    %150 = vector.broadcast %cst_64 : f32 to vector<8x64xf32>
    %151 = arith.mulf %150, %149 : vector<8x64xf32>
    %152 = arith.mulf %149, %149 : vector<8x64xf32>
    %153 = arith.mulf %149, %152 : vector<8x64xf32>
    %cst_65 = arith.constant 4.471500e-02 : f32
    %154 = vector.broadcast %cst_65 : f32 to vector<8x64xf32>
    %155 = arith.mulf %154, %153 : vector<8x64xf32>
    %156 = arith.addf %149, %155 : vector<8x64xf32>
    %cst_66 = arith.constant 0.797884583 : f32
    %157 = vector.broadcast %cst_66 : f32 to vector<8x64xf32>
    %158 = arith.mulf %157, %156 : vector<8x64xf32>
    %159 = math.tanh %158 : vector<8x64xf32>
    %cst_67 = arith.constant 1.000000e+00 : f32
    %160 = vector.broadcast %cst_67 : f32 to vector<8x64xf32>
    %161 = arith.addf %160, %159 : vector<8x64xf32>
    %162 = arith.mulf %151, %161 : vector<8x64xf32>
    %163 = arith.truncf %162 : vector<8x64xf32> to vector<8x64xbf16>
    %c0_68 = arith.constant 0 : index
    %c0_69 = arith.constant 0 : index
    %164 = vector.load %arg19[%c0_68, %c0_69] : memref<64x32xbf16, #tpu.memory_space<vmem>>, vector<64x32xbf16>
    %cst_70 = arith.constant dense<0.000000e+00> : vector<8x32xf32>
    %165 = tpu.matmul %163, %164, %cst_70 {dimension_numbers = #tpu.dot_dimension_numbers<[1], [0], [0], [1], [0, 0, 1, 1], [], []>} : vector<8x64xbf16>, vector<64x32xbf16>, vector<8x32xf32> -> vector<8x32xf32>
    %c0_71 = arith.constant 0 : index
    %c0_72 = arith.constant 0 : index
    %166 = vector.load %arg20[%c0_71, %c0_72] : memref<1x32xf32, #tpu.memory_space<vmem>>, vector<1x32xf32>
    %167 = vector.broadcast %166 : vector<1x32xf32> to vector<8x32xf32>
    %168 = arith.addf %165, %167 : vector<8x32xf32>
    %169 = arith.addf %168, %119 : vector<8x32xf32>
    %c0_73 = arith.constant 0 : index
    %c0_74 = arith.constant 0 : index
    %c0_75 = arith.constant 0 : index
    %170 = vector.load %arg21[%c0_73, %c0_74, %c0_75] : memref<1x8x32xf32, #tpu.memory_space<vmem>>, vector<1x8x32xf32>
    %171 = vector.shape_cast %170 : vector<1x8x32xf32> to vector<8x32xf32>
    %172 = vector.shape_cast %169 : vector<8x32xf32> to vector<1x8x32xf32>
    tpu.vector_store %arg21[%c0_73, %c0_74, %c0_75], %172 {strides = array<i32>} : memref<1x8x32xf32, #tpu.memory_space<vmem>>, vector<1x8x32xf32>,
    return
  }
  func.func @transform_0(%arg0: i32, %arg1: i32) -> (i32, i32, i32) {
    %c0_i32 = arith.constant 0 : i32
    %c0_i32_0 = arith.constant 0 : i32
    return %arg0, %arg1, %c0_i32 : i32, i32, i32
  }
  func.func @transform_1(%arg0: i32, %arg1: i32) -> (i32, i32, i32) {
    %c0_i32 = arith.constant 0 : i32
    %c0_i32_0 = arith.constant 0 : i32
    %c0_i32_1 = arith.constant 0 : i32
    return %arg0, %c0_i32, %c0_i32_0 : i32, i32, i32
  }
  func.func @transform_2(%arg0: i32, %arg1: i32) -> (i32, i32, i32) {
    %c0_i32 = arith.constant 0 : i32
    %c0_i32_0 = arith.constant 0 : i32
    %c0_i32_1 = arith.constant 0 : i32
    return %arg0, %c0_i32, %c0_i32_0 : i32, i32, i32
  }
  func.func @transform_3(%arg0: i32, %arg1: i32) -> (i32, i32) {
    %c0_i32 = arith.constant 0 : i32
    %c0_i32_0 = arith.constant 0 : i32
    %c0_i32_1 = arith.constant 0 : i32
    return %c0_i32, %c0_i32_0 : i32, i32
  }
  func.func @transform_4(%arg0: i32, %arg1: i32) -> (i32, i32) {
    %c0_i32 = arith.constant 0 : i32
    %c0_i32_0 = arith.constant 0 : i32
    %c0_i32_1 = arith.constant 0 : i32
    return %c0_i32, %c0_i32_0 : i32, i32
  }
  func.func @transform_5(%arg0: i32, %arg1: i32) -> (i32, i32) {
    %c0_i32 = arith.constant 0 : i32
    %c0_i32_0 = arith.constant 0 : i32
    %c0_i32_1 = arith.constant 0 : i32
    return %c0_i32, %c0_i32_0 : i32, i32
  }
  func.func @transform_6(%arg0: i32, %arg1: i32) -> (i32, i32) {
    %c0_i32 = arith.constant 0 : i32
    %c0_i32_0 = arith.constant 0 : i32
    %c0_i32_1 = arith.constant 0 : i32
    return %c0_i32, %c0_i32_0 : i32, i32
  }
  func.func @transform_7(%arg0: i32, %arg1: i32) -> (i32, i32) {
    %c0_i32 = arith.constant 0 : i32
    %c0_i32_0 = arith.constant 0 : i32
    %c0_i32_1 = arith.constant 0 : i32
    return %c0_i32, %c0_i32_0 : i32, i32
  }
  func.func @transform_8(%arg0: i32, %arg1: i32) -> (i32, i32) {
    %c0_i32 = arith.constant 0 : i32
    %c0_i32_0 = arith.constant 0 : i32
    %c0_i32_1 = arith.constant 0 : i32
    return %c0_i32, %c0_i32_0 : i32, i32
  }
  func.func @transform_9(%arg0: i32, %arg1: i32) -> (i32, i32) {
    %c0_i32 = arith.constant 0 : i32
    %c0_i32_0 = arith.constant 0 : i32
    %c0_i32_1 = arith.constant 0 : i32
    return %c0_i32, %c0_i32_0 : i32, i32
  }
  func.func @transform_10(%arg0: i32, %arg1: i32) -> (i32, i32) {
    %c0_i32 = arith.constant 0 : i32
    %c0_i32_0 = arith.constant 0 : i32
    %c0_i32_1 = arith.constant 0 : i32
    return %c0_i32, %c0_i32_0 : i32, i32
  }
  func.func @transform_11(%arg0: i32, %arg1: i32) -> (i32, i32, i32) {
    %c0_i32 = arith.constant 0 : i32
    %c0_i32_0 = arith.constant 0 : i32
    %c0_i32_1 = arith.constant 0 : i32
    %c0_i32_2 = arith.constant 0 : i32
    return %c0_i32, %c0_i32_0, %c0_i32_1 : i32, i32, i32
  }
  func.func @transform_12(%arg0: i32, %arg1: i32) -> (i32, i32) {
    %c0_i32 = arith.constant 0 : i32
    %c0_i32_0 = arith.constant 0 : i32
    %c0_i32_1 = arith.constant 0 : i32
    return %c0_i32, %c0_i32_0 : i32, i32
  }
  func.func @transform_13(%arg0: i32, %arg1: i32) -> (i32, i32) {
    %c0_i32 = arith.constant 0 : i32
    %c0_i32_0 = arith.constant 0 : i32
    %c0_i32_1 = arith.constant 0 : i32
    return %c0_i32, %c0_i32_0 : i32, i32
  }
  func.func @transform_14(%arg0: i32, %arg1: i32) -> (i32, i32) {
    %c0_i32 = arith.constant 0 : i32
    %c0_i32_0 = arith.constant 0 : i32
    %c0_i32_1 = arith.constant 0 : i32
    return %c0_i32, %c0_i32_0 : i32, i32
  }
  func.func @transform_15(%arg0: i32, %arg1: i32) -> (i32, i32) {
    %c0_i32 = arith.constant 0 : i32
    %c0_i32_0 = arith.constant 0 : i32
    %c0_i32_1 = arith.constant 0 : i32
    return %c0_i32, %c0_i32_0 : i32, i32
  }
  func.func @transform_16(%arg0: i32, %arg1: i32) -> (i32, i32) {
    %c0_i32 = arith.constant 0 : i32
    %c0_i32_0 = arith.constant 0 : i32
    %c0_i32_1 = arith.constant 0 : i32
    return %c0_i32, %c0_i32_0 : i32, i32
  }
  func.func @transform_17(%arg0: i32, %arg1: i32) -> (i32, i32) {
    %c0_i32 = arith.constant 0 : i32
    %c0_i32_0 = arith.constant 0 : i32
    %c0_i32_1 = arith.constant 0 : i32
    return %c0_i32, %c0_i32_0 : i32, i32
  }
  func.func @transform_18(%arg0: i32, %arg1: i32) -> (i32, i32) {
    %c0_i32 = arith.constant 0 : i32
    %c0_i32_0 = arith.constant 0 : i32
    %c0_i32_1 = arith.constant 0 : i32
    return %c0_i32, %c0_i32_0 : i32, i32
  }
  func.func @transform_19(%arg0: i32, %arg1: i32) -> (i32, i32, i32) {
    %c0_i32 = arith.constant 0 : i32
    %c0_i32_0 = arith.constant 0 : i32
    return %arg0, %arg1, %c0_i32 : i32, i32, i32
  }
}

</mosaic_0001>

<bundles_post_ra>
// kernel: tpu_custom_call.1
= control target key start
LH: loop header
LB: loop body
LE: loop exit
PB: predicated region body
PF: predicated region fallthrough
CT: control target
= control target key end

     0   :  { %s3287_s0 = inlined_call_operand.vmem [shape: f32[2,8,32], index: 0, kind: input, shape index: {}]   ;;  %s3288_s1 = inlined_call_operand.vmem [shape: f32[2,8,32], index: 1, kind: input, shape index: {}]   ;;  %s3289_s2 = inlined_call_operand.hbm [shape: f32[2,1,8], index: 2, kind: input, shape index: {}]   ;;  %s3290_s3 = inlined_call_operand.hbm [shape: f32[1,32], index: 3, kind: input, shape index: {}]   ;;  %s3291_s4 = inlined_call_operand.hbm [shape: f32[1,32], index: 4, kind: input, shape index: {}]   ;;  %s3292_s5 = inlined_call_operand.vmem [shape: bf16[32,32], index: 5, kind: input, shape index: {}]   ;;  %s3293_s6 = inlined_call_operand.hbm [shape: f32[1,32], index: 6, kind: input, shape index: {}]   ;;  %s3294_s7 = inlined_call_operand.hbm [shape: bf16[32,32], index: 7, kind: input, shape index: {}]   ;;  %s3295_s8 = inlined_call_operand.hbm [shape: f32[1,32], index: 8, kind: input, shape index: {}]   ;;  %s3296_s9 = inlined_call_operand.vmem [shape: bf16[32,32], index: 9, kind: input, shape index: {}]   ;;  %s3297_s10 = inlined_call_operand.vmem [shape: f32[1,32], index: 10, kind: input, shape index: {}]   ;;  %s3298_s11 = inlined_call_operand.hbm [shape: bf16[4,8,32], index: 11, kind: input, shape index: {}]   ;;  %s3299_s12 = inlined_call_operand.vmem [shape: f32[1,32], index: 12, kind: input, shape index: {}]   ;;  %s3300_s13 = inlined_call_operand.vmem [shape: f32[1,32], index: 13, kind: input, shape index: {}]   ;;  %s3301_s14 = inlined_call_operand.vmem [shape: f32[1,32], index: 14, kind: input, shape index: {}]   ;;  %s3302_s15 = inlined_call_operand.hbm [shape: bf16[32,64], index: 15, kind: input, shape index: {}]   ;;  %s3303_s16 = inlined_call_operand.vmem [shape: f32[1,64], index: 16, kind: input, shape index: {}]   ;;  %s3304_s17 = inlined_call_operand.vmem [shape: bf16[64,32], index: 17, kind: input, shape index: {}]   ;;  %s3305_s18 = inlined_call_operand.vmem [shape: f32[1,32], index: 18, kind: input, shape index: {}]   ;;  %s3306_s19 = inlined_call_operand.hbm [shape: f32[2,8,32], index: 19, kind: output, shape index: {}]  }
   0x1   :  { %3314 = sst [smem:[#allocation26_spill]] %s3287_s0 }
   0x2   :  { %3315 = sst [smem:[#allocation27_spill]] %s3288_s1 }
   0x3   :  { %3316 = sst [smem:[#allocation28_spill]] %s3289_s2 }
   0x4   :  { %3317 = sst [smem:[#allocation29_spill]] %s3290_s3 }
   0x5   :  { %3318 = sst [smem:[#allocation30_spill]] %s3291_s4 }
   0x6   :  { %3319 = sst [smem:[#allocation31_spill]] %s3293_s6 }
   0x7   :  { %3320 = sst [smem:[#allocation32_spill]] %s3294_s7 }
   0x8   :  { %3321 = sst [smem:[#allocation33_spill]] %s3295_s8 }
   0x9   :  { %3322 = sst [smem:[#allocation34_spill]] %s3298_s11 }
   0xa   :  { %3323 = sst [smem:[#allocation35_spill]] %s3301_s14 }
   0xb   :  { %3324 = sst [smem:[#allocation36_spill]] %s3302_s15 }
   0xc   :  { %3325 = sst [smem:[#allocation37_spill]] %s3303_s16 }
   0xd   :  { %3326 = sst [smem:[#allocation38_spill]] %s3304_s17 }
   0xe   :  { %3327 = sst [smem:[#allocation39_spill]] %s3305_s18 }
   0xf   :  { %3328 = sst [smem:[#allocation40_spill]] %s3306_s19 }
  0x10   :  { %24 = vsyncpa [#allocation5], 0 }
  0x11   :  { %26 = vsyncpa [#allocation5 + $0x1], 0 }
  0x12   :  { %27 = vsyncpa [#allocation8], 0 }
  0x13   :  { %28 = vsyncpa [#allocation11], 0 }
  0x14   :  { %29 = vsyncpa [#allocation14], 0 }
  0x15   :  { %30 = vsyncpa [#allocation17], 0 }
  0x16   :  { %31 = vsyncpa [#allocation6], 0 }
  0x17   :  { %33 = vsyncpa [#allocation6 + $0x1], 0  ;;  %s2839_s0 = smov 0   ;;  %s2841_s30 = smov 0  }
  0x18   :  { %s2843_s20 = smov 0   ;;  %s2845_s21 = smov 0  }
  0x19   :  { %s2847_s1 = smov 0   ;;  %s2849_s22 = smov 0  }
  0x1a LB: > { %s3307_s2 = sadd.s32 4294967295, %s2721_s22   ;;  %p2020_p0 = scmp.ge.s32.totalorder %s2721_s22, 1  ;;  %s2721_s22 = sphi %s2849_s22, %s39_s22   ;;  %s2717_s1 = sphi %s2847_s1, %s3364_s1   ;;  %s2713_s21 = sphi %s2845_s21, %s3363_s21   ;;  %s2709_s20 = sphi %s2843_s20, %s3362_s20   ;;  %s2705_s30 = sphi %s2841_s30, %s3361_s30   ;;  %s2701_s0 = sphi %s2839_s0, %s3360_s0  }
  0x1b   : > { %p2873_p1 = scmp.eq.s32.totalorder %s3307_s2, 0  ;;  %p500_p2 = scmp.lt.s32.totalorder %s2721_s22, 3 }
  0x1c   : > { %s2723_s25 = smov [#allocation7]   ;;  %s2724_s26 = smov [#allocation10]  }
  0x1d   : > { %s3329_s23 = scalar_select %p2873_p1, 1, 0 }
  0x1e   : > { %p2878_p3 = pnand %p2020_p0, %p500_p2  ;;  %s513_s3 = sshll.u32 %s2723_s25, 4  ;;  %s514_s3 = int_to_ptr.vmem [resolvable:$true] %s513_s3 }
  0x1f   : > { %s538_s27 = sshll.u32 %s2724_s26, 4  ;;  %s2725_s29 = smov [#allocation13]   ;;  %s539_s27 = int_to_ptr.vmem [resolvable:$true] %s538_s27 }
  0x20   : > { %s3330_s24 = scalar_select %p2878_p3, 1, 0 }
  0x21   : > { %p2273_p5 = pneg %p2878_p3  ;;  %s562_s2 = sshll.u32 %s2725_s29, 4  ;;  %s2891_s2 = int_to_ptr.vmem [resolvable:$true] %s562_s2 }
  0x22   : > { %s2426_s19 = scalar_lea.vmem %s514_s3, 16  ;;  %s2433_s26 = scalar_lea.vmem %s514_s3, 32 }
  0x23   : > { %p2887_p6 = pnand %p2273_p5, %p2873_p1  ;;  %p2427_p8 = scmp.ne.s32.totalorder %s514_s3, %s2426_s19 }
  0x24   : > { %p2434_p11 = scmp.lt.s32.totalorder %s514_s3, %s514_s3  ;;  %p2435_p12 = scmp.lt.s32.totalorder %s2433_s26, %s2426_s19 }
  0x25   : > { %p2895_p7 = pneg %p2887_p6 }
  0x26   : > { %p2436_p13 = por %p2435_p12, %p2434_p11 }
  0x27   : > { %p2429_p9 = pnand %p2427_p8, %p2895_p7 }
  0x29   : > { %p2430_p10 = pneg %p2429_p9 }
  0x2b   : > { %p2437_p0 = pnand %p2436_p13, %p2430_p10 }
  0x2d   : > { %2440 = shalt.err (!%p2437_p0)
}
  0x2e   : > { %s3333_s16 = sld [smem:[#allocation29_spill]]  ;;  %s2452_s17 = scalar_lea.vmem %s539_s27, 16 }
  0x2f   : > { %p2453_p2 = scmp.ne.s32.totalorder %s539_s27, %s2452_s17  ;;  %s2459_s14 = scalar_lea.vmem %s539_s27, 32 }
  0x30   : > { %p2460_p8 = scmp.lt.s32.totalorder %s539_s27, %s539_s27  ;;  %p2461_p9 = scmp.lt.s32.totalorder %s2459_s14, %s2452_s17 }
  0x31   : > { %p2455_p5 = pnand %p2453_p2, %p2895_p7 }
  0x32   : > { %p2462_p3 = por %p2461_p9, %p2460_p8 }
  0x33   : > { %p2456_p4 = pneg %p2455_p5 }
  0x34   : > { %2276 = dma.hbm_to_vmem [thread:$0]  (!%p2887_p6), %s3333_s16, 16, %s514_s3, [#allocation8]  }
  0x35   : > { %p2463_p1 = pnand %p2462_p3, %p2456_p4 }
  0x37   : > { %2466 = shalt.err (!%p2463_p1)
}
  0x38   : > { %s3334_s6 = sld [smem:[#allocation31_spill]]  ;;  %s2478_s16 = scalar_lea.vmem %s2891_s2, 16 }
  0x39   : > { %p2479_p10 = scmp.ne.s32.totalorder %s2891_s2, %s2478_s16  ;;  %s2485_s14 = scalar_lea.vmem %s2891_s2, 32 }
  0x3a   : > { %p2486_p3 = scmp.lt.s32.totalorder %s2891_s2, %s2891_s2  ;;  %p2487_p1 = scmp.lt.s32.totalorder %s2485_s14, %s2478_s16 }
  0x3b   : > { %p2481_p11 = pnand %p2479_p10, %p2895_p7 }
  0x3c   : > { %p2488_p4 = por %p2487_p1, %p2486_p3 }
  0x3d   : > { %p2482_p12 = pneg %p2481_p11 }
  0x3e   : > { %2282 = dma.hbm_to_vmem [thread:$0]  (!%p2887_p6), %s3334_s6, 16, %s539_s27, [#allocation11]  }
  0x3f   : > { %p2489_p13 = pnand %p2488_p4, %p2482_p12 }
  0x41   : > { %2492 = shalt.err (!%p2489_p13)
}
  0x42   : > { %s3335_s8 = sld [smem:[#allocation33_spill]]  ;;  %s2726_s3 = smov [#allocation9]  }
  0x43   : > { %s524_s27 = sshll.u32 %s2726_s3, 4  ;;  %s2727_s29 = smov [#allocation12]   ;;  %s525_s27 = int_to_ptr.vmem [resolvable:$true] %s524_s27 }
  0x44   : > { %s548_s19 = sshll.u32 %s2727_s29, 4  ;;  %s2504_s26 = scalar_lea.vmem %s525_s27, 16  ;;  %s549_s19 = int_to_ptr.vmem [resolvable:$true] %s548_s19 }
  0x45   : > { %p2505_p0 = scmp.ne.s32.totalorder %s525_s27, %s2504_s26  ;;  %s2511_s16 = scalar_lea.vmem %s525_s27, 32 }
  0x46   : > { %p2512_p8 = scmp.lt.s32.totalorder %s525_s27, %s525_s27  ;;  %p2513_p9 = scmp.lt.s32.totalorder %s2511_s16, %s2504_s26 }
  0x47   : > { %p2507_p2 = pnand %p2505_p0, %p2895_p7 }
  0x48   : > { %2288 = dma.hbm_to_vmem [thread:$0]  (!%p2887_p6), %s3335_s8, 16, %s2891_s2, [#allocation14]  }
  0x49   : > { %p2508_p5 = pneg %p2507_p2  ;;  %p2514_p10 = por %p2513_p9, %p2512_p8 }
  0x4b   : > { %p2515_p11 = pnand %p2514_p10, %p2508_p5 }
  0x4d   : > { %2518 = shalt.err (!%p2515_p11)
}
  0x4e   : > { %s3336_s4 = sld [smem:[#allocation30_spill]]  ;;  %s2530_s17 = scalar_lea.vmem %s549_s19, 256 }
  0x4f   : > { %p2531_p12 = scmp.ne.s32.totalorder %s549_s19, %s2530_s17  ;;  %p2538_p4 = scmp.lt.s32.totalorder %s549_s19, %s549_s19 }
  0x50   : > { %p2539_p13 = scmp.lt.s32.totalorder %s2530_s17, %s2530_s17 }
  0x51   : > { %p2533_p3 = pnand %p2531_p12, %p2895_p7 }
  0x52   : > { %p2540_p0 = por %p2539_p13, %p2538_p4 }
  0x53   : > { %p2534_p1 = pneg %p2533_p3 }
  0x54   : > { %2279 = dma.hbm_to_vmem [thread:$0]  (!%p2887_p6), %s3336_s4, 16, %s525_s27, [#allocation8]  }
  0x55   : > { %p2541_p2 = pnand %p2540_p0, %p2534_p1 }
  0x57   : > { %2544 = shalt.err (!%p2541_p2)
}
  0x58   : > { %s2728_s18 = smov 64   ;;  %s2729_s3 = smov 4  }
  0x59   : > { %s3337_s7 = sld [smem:[#allocation32_spill]]  ;;  %s2730_s26 = smov [#allocation15]  }
  0x5a   : > { %s578_s16 = sshll.u32 %s2730_s26, 4  ;;  %s2731_s14 = smov [#allocation16]   ;;  %s579_s16 = int_to_ptr.vmem [resolvable:$true] %s578_s16 }
  0x5b   : > { %s600_s2 = sshll.u32 %s2731_s14, 4  ;;  %s2556_s17 = scalar_lea.vmem %s579_s16, 256  ;;  %s601_s2 = int_to_ptr.vmem [resolvable:$true] %s600_s2 }
  0x5c   : > { %p2557_p5 = scmp.ne.s32.totalorder %s579_s16, %s2556_s17  ;;  %p2564_p10 = scmp.lt.s32.totalorder %s579_s16, %s579_s16 }
  0x5d   : > { %p2565_p11 = scmp.lt.s32.totalorder %s2556_s17, %s2556_s17 }
  0x5e   : > { %p2559_p8 = pnand %p2557_p5, %p2895_p7 }
  0x5f   : > { %2285 = dma.hbm_to_vmem [thread:$0]  (!%p2887_p6), %s3337_s7, 256, %s549_s19, [#allocation11], %s2728_s18, %s2728_s18, %s2729_s3  }
  0x60   : > { %p2560_p9 = pneg %p2559_p8  ;;  %p2566_p12 = por %p2565_p11, %p2564_p10 }
  0x62   : > { %p2567_p3 = pnand %p2566_p12, %p2560_p9 }
  0x64   : > { %2570 = shalt.err (!%p2567_p3)
}
  0x65   : > { %s3338_s11 = sld [smem:[#allocation34_spill]]  ;;  %s2582_s29 = scalar_lea.vmem %s601_s2, 256 }
  0x66   : > { %p2583_p1 = scmp.ne.s32.totalorder %s601_s2, %s2582_s29  ;;  %p2590_p0 = scmp.lt.s32.totalorder %s601_s2, %s601_s2 }
  0x67   : > { %p2591_p2 = scmp.lt.s32.totalorder %s2582_s29, %s2582_s29 }
  0x68   : > { %p2585_p4 = pnand %p2583_p1, %p2895_p7 }
  0x69   : > { %p2592_p5 = por %p2591_p2, %p2590_p0 }
  0x6a   : > { %p2586_p13 = pneg %p2585_p4 }
  0x6b   : > { %2291 = dma.hbm_to_vmem [thread:$0]  (!%p2887_p6), %s3338_s11, 256, %s579_s16, [#allocation14], %s2728_s18, %s2728_s18, %s2729_s3  }
  0x6c   : > { %p2593_p8 = pnand %p2592_p5, %p2586_p13 }
  0x6e   : > { %2596 = shalt.err (!%p2593_p8)
}
  0x6f   : > { %s3339_s15 = sld [smem:[#allocation36_spill]]  ;;  %s2019_s28 = sadd.s32 4294967294, %s2721_s22  }
  0x70   : > { %s51_s25 = sadd.s32 1, %s2717_s1  ;;  %s112_s16 = sadd.s32 1, %s2709_s20 }
  0x71   : > { %p53_p7 = scmp.ge.s32.totalorder %s51_s25, 2  ;;  %p119_p9 = scmp.ne.s32.totalorder %s2709_s20, %s2705_s30 }
  0x72   : > { %p120_p10 = scmp.eq.s32.totalorder %s2721_s22, 0  ;;  %p125_p11 = scmp.ne.s32.totalorder %s2705_s30, %s2701_s0 }
  0x73   : > { %s3366_s25 = smov (%p53_p7, %s51_s25), 0  ;;  %p3342_p3 = scmp.ne.s32.totalorder %s3329_s23, 0 }
  0x74   : > { %3340 = sst [smem:[#allocation25_spill]] %s3366_s25  ;;  %p2973_p12 = por %p120_p10, %p119_p9 }
  0x75   : > { %2294 = dma.hbm_to_vmem [thread:$0]  (!%p2887_p6), %s3339_s15, 256, %s601_s2, [#allocation17], %s2728_s18, %s2728_s18, %s2729_s3  }
  0x76   : > { %p2979_p6 = por %p3342_p3, %p125_p11  ;;  %s109_s3 = ssub.s32 %s2717_s1, %s3366_s25 }
  0x77   : > { %s3344_s2 = sadd.s32 4294967295, %s2721_s22   ;;  %p110_p4 = scmp.eq.s32.totalorder %s109_s3, 0 }
  0x78   : > { %p487_p1 = scmp.eq.s32.totalorder %s3344_s2, 1  ;;  %p493_p13 = scmp.eq.s32.totalorder %s2019_s28, 1 }
  0x79   : > { %p2310_p2 = scmp.lt.s32.totalorder %s2721_s22, 2  ;;  %s640_s26 = sand.u32 1, %s2709_s20  }
  0x7a   : > { %p2987_p0 = por %p487_p1, %p119_p9  ;;  %p2995_p5 = por %p493_p13, %p125_p11 }
  0x7b   : > { %s2993_s27 = scalar_select %p110_p4, %s2709_s20, %s112_s16  }
  0x7c   : > { %s2029_s14 = sshll.u32 %s2717_s1, 4  ;;  %s643_s4 = scalar_lea.vmem [#allocation4], %s640_s26 }
  0x7d   : > { %s650_s6 = sshll.u32 %s643_s4, 4  ;;  %s3347_s2 = sld [smem:[#allocation28_spill]]  ;;  %s651_s6 = int_to_ptr.vmem [resolvable:$true] %s650_s6 }
  0x7e   : > { %p3006_p8 = pnand %p2310_p2, %p2973_p12  ;;  %s641_s16 = scalar_lea.sflag [#allocation5], %s640_s26 }
  0x7f   : > { %s2610_s11 = scalar_lea.vmem %s651_s6, 16  ;;  %s2732_s15 = smov [#allocation4]  }
  0x80   : > { %p2599_p7 = pneg %p3006_p8  ;;  %p2611_p9 = scmp.ne.s32.totalorder %s651_s6, %s2610_s11 }
  0x81   : > { %s2615_s4 = sshll.u32 %s2732_s15, 4  ;;  %s2616_s4 = int_to_ptr.vmem [resolvable:$false] %s2615_s4 }
  0x82   : > { %p2613_p10 = pnand %p2611_p9, %p2599_p7  ;;  %s2617_s25 = scalar_lea.vmem %s2616_s4, 32 }
  0x83   : > { %s648_s3 = scalar_lea.hbm %s3347_s2, %s2029_s14  ;;  %p2618_p3 = scmp.lt.s32.totalorder %s651_s6, %s2616_s4 }
  0x84   : > { %p2614_p11 = pneg %p2613_p10  ;;  %p2619_p1 = scmp.lt.s32.totalorder %s2617_s25, %s2610_s11 }
  0x86   : > { %p2620_p4 = por %p2619_p1, %p2618_p3 }
  0x88   : > { %p2621_p13 = pnand %p2620_p4, %p2614_p11 }
  0x8a   : > { %2624 = shalt.err (!%p2621_p13)
}
  0x8b   : > { %2298 = dma.hbm_to_vmem [thread:$0]  (!%p3006_p8), %s648_s3, 16, %s651_s6, %s641_s16  }
  0x8c   : > { %p3349_p12 = scmp.ne.s32.totalorder %s3330_s24, 0 }
  0x8d   : > { %s3017_s7 = sand.u32 (!%p3349_p12), 1, %s2705_s30  }
  0x8e   : > { %659 = sbr.rel (%p3349_p12) target bundleno = 3375 (0xd2f), region = 96  ;;  %s662_s8 = scalar_lea.sflag (!%p3349_p12), [#allocation5], %s3017_s7 }
  0x8f   : > { %s664_s15 = scalar_lea.vmem (!%p3349_p12), [#allocation4], %s3017_s7 }
  0x93   : > { %2676 = dma.done.wait (%p2979_p6), %s662_s8, 16  }
  0x94   : > { %2678 = vsyncadd (%p2979_p6), %s662_s8, 4294967280  ;;  %p3350_p2 = scmp.ne.s32.totalorder %s3329_s23, 0 }
  0x96   : > { %2680 = dma.done.wait (%p3350_p2), [#allocation8], 32  }
  0x97   : > { %2682 = vsyncadd (%p3350_p2), [#allocation8], 4294967264 }
  0x98   : > { %2684 = dma.done.wait (%p3350_p2), [#allocation11], 272  }
  0x99   : > { %2686 = vsyncadd (%p3350_p2), [#allocation11], 4294967024 }
  0x9a   : > { %2688 = dma.done.wait (%p3350_p2), [#allocation14], 272  }
  0x9b   : > { %2690 = vsyncadd (%p3350_p2), [#allocation14], 4294967024 }
  0x9c   : > { %2692 = dma.done.wait (%p3350_p2), [#allocation17], 256  }
  0x9d   : > { %2694 = vsyncadd (%p3350_p2), [#allocation17], 4294967040  ;;  %p757_p6 = scmp.lt.s32.totalorder %s2713_s21, 1  ;;  %v2733_v0 = vmov 0.0   ;;  %vm2734_vm0 = vmmov 0   ;;  %s3351_s25 = sld [smem:[#allocation27_spill]]  ;;  %v987_v41 = vlaneseq }
  0x9e   : > { %2125 = vmatprep.subr.bf16.mxu1 %v2733_v0  ;;  %2129 = vmatprep.mubr.msk.bf16.mxu1 %vm2734_vm0, %v2733_v0  ;;  %v2381_v1 = vld [vmem:[#allocation12 + $0x8] sm:$0xff]   ;;  %v2382_v2 = vld [vmem:[#allocation12] sm:$0xff]   ;;  %s3352_s14 = sld [smem:[#allocation26_spill]]  ;;  %v2383_v4 = vld [vmem:[%s3292_s5 + $0x8] sm:$0xff]   ;;  %vm800_vm1 = vcmask 261120   ;;  %vm908_vm2 = vcmask 257024  }
  0x9f   : > { %s758_s6 = scalar_select %p757_p6, %s2713_s21, 1  ;;  %2141 = vmatprep.subr.bf16.mxu0 %v2733_v0  ;;  %2145 = vmatprep.mubr.msk.bf16.mxu0 %vm2734_vm0, %v2733_v0  ;;  %v2384_v5 = vld [vmem:[%s3292_s5] sm:$0xff]   ;;  %v2385_v9 = vld [vmem:[%s3296_s9 + $0x8] sm:$0xff]   ;;  %vm992_vm3 = vcmask 64512   ;;  %vm1054_vm4 = vcmask 1043456   ;;  %v988_v43 = vshrl.u32 %v987_v41, 7 }
  0xa0   : > { %2126 = vmatpush3.bf16.msra.mxu1 %v2381_v1  ;;  %2142 = vmatpush3.bf16.msra.mxu0 %v2383_v4  ;;  %v2386_v10 = vld [vmem:[%s3296_s9] sm:$0xff]   ;;  %v2049_v20 = vld [vmem:[#allocation10] ss:$0 sm:$0xff]  ;;  %s2735_s23 = smov 120   ;;  %s2737_s18 = smov 104   ;;  %vm1787_vm6 = vcmask 523264  }
  0xa1   : > { %s2039_s11 = sshll.u32 %s758_s6, 3  ;;  %2127 = vmatprep.subr.bf16.mxu1 %v2733_v0  ;;  %2143 = vmatprep.subr.bf16.mxu0 %v2733_v0  ;;  %v2041_v11 = vld [vmem:[#allocation13] ss:$0 sm:$0xff]  ;;  %v989_v44 = vsub.s32 0, %v988_v43  ;;  %s3353_s4 = sld [smem:[#allocation35_spill]] }
  0xa2   : > { %v2045_v29 = vld [vmem:[%s3297_s10] ss:$0 sm:$0xff]  ;;  %s2038_s3 = sshll.u32 %s3017_s7, 3  ;;  %s2081_s8 = sshll.u32 %s2713_s21, 7 }
  0xa3   : > { %s767_s17 = scalar_lea.vmem %s3351_s25, %s2039_s11  ;;  %v770_v42 = vld [vmem:[%s664_s15] sm:$0x1]  ;;  %s2736_s15 = smov 112  }
  0xa4   : > { %s763_s2 = scalar_lea.vmem %s3352_s14, %s2039_s11  ;;  %v775_v3 = vld [vmem:[%s767_s17] sm:$0xff]  ;;  %2128 = vmatpush3.bf16.msra.mxu1 %v2382_v2  ;;  %2144 = vmatpush3.bf16.msra.mxu0 %v2384_v5  ;;  %vm984_vm5 = vcmp.gt.f32.partialorder %v770_v42, 0.5  ;;  %s3354_s11 = sld [smem:[#allocation38_spill]] }
  0xa5   : > { %v3062_v6 = vld [vmem:[%s763_s2] sm:$0xff]  ;;  %v776_v7 = vpack.c.bf16 %v775_v3, %v775_v3  ;;  %2133 = vmatprep.subr.bf16.mxu1 %v2733_v0  ;;  %2155 = vmatprep.subr.bf16.mxu0 %v2733_v0  ;;  %v985_v45 = vsel %vm984_vm5, -1e+18, %v2733_v0  ;;  %s3355_s2 = sld [smem:[#allocation37_spill]]  ;;  %s756_s6 = scalar_lea.vmem [#allocation18], %s2038_s3 }
  0xa6   : > { %v912_v8 = vpack.c.bf16 %v3062_v6, %v3062_v6  ;;  %v3115_v46 = vrot.slane %v985_v45, %v989_v44  ;;  %s1848_s24 = sshll.u32 %s756_s6, 4  ;;  %s3357_s17 = sld [smem:[#allocation40_spill]]  ;;  %s3240_s24 = int_to_ptr.vmem [resolvable:$true] %s1848_s24 }
  0xa7   : > { %2130 = vmatmul.mubr.msk.bf16.vlgmr.msra.gmra.mxu1 %vm800_vm1, %v776_v7  ;;  %s1834_s21 = scalar_lea.sflag [#allocation6], %s3017_s7  ;;  %s2738_s26 = smov [#allocation18]  }
  0xa8   : > { %2137 = vmatprep.mubr.msk.bf16.mxu1 %vm2734_vm0, %v2733_v0  ;;  %2146 = vmatmul.mubr.msk.bf16.vlgmr.msra.gmra.mxu0 %vm800_vm1, %v912_v8  ;;  %s2629_s14 = sshll.u32 %s2738_s26, 4  ;;  %s2630_s14 = int_to_ptr.vmem [resolvable:$false] %s2629_s14 }
  0xa9   : > { %2157 = vmatprep.mubr.msk.bf16.mxu0 %vm2734_vm0, %v2733_v0  ;;  %2134 = vmatpush3.bf16.msra.mxu1 %v2385_v9  ;;  %p2632_p10 = scmp.lt.s32.totalorder %s3240_s24, %s2630_s14 }
  0xaa   : > { %2135 = vmatprep.subr.bf16.mxu1 %v2733_v0 }
  0xad   : > { %2136 = vmatpush3.bf16.msra.mxu1 %v2386_v10 }
  0xae   : > { %2149 = vmatprep.subr.bf16.mxu1 %v2733_v0 }
  0xb0   : > { %2138 = vmatmul.mubr.msk.bf16.vlgmr.msra.gmra.mxu1 %vm800_vm1, %v776_v7 }
  0xb1   : > { %2151 = vmatprep.mubr.msk.bf16.mxu1 %vm2734_vm0, %v2733_v0 }
 0x167   : > { %v838_v12 = vpop.f32.mrf.mxu1 }
 0x168   : > { %v839_v13 = vadd.f32 %v2041_v11, %v838_v12  ;;  %v974_v16 = vpop.f32.mrf.mxu0  ;;  %v1219_v12 = vld [vmem:[#allocation15 + $0x4] sm:$0xf] }
 0x169   : > { %v2131_v14 = vpop.f32.mrf.mxu1  ;;  %v975_v22 = vadd.f32 %v2049_v20, %v974_v16 }
 0x16a   : > { %v907_v15 = vpack.c.bf16 %v839_v13, %v839_v13  ;;  %v2147_v18 = vpop.f32.mrf.mxu0  ;;  %v1224_v13 = vsel %vm1054_vm4, %v1219_v12, 0 }
 0x16b   : > { %v841_v17 = vpop.f32.mrf.mxu1  ;;  %v980_v25 = vmul.f32 0.35355338, %v975_v22  ;;  %v1099_v18 = vld [vmem:[#allocation15] sm:$0xf] }
 0x16c   : > { %909 = vst.msk [vmem:[#allocation2] sm:$0xf] %vm908_vm2, %v907_v15  ;;  %v977_v21 = vpop.f32.mrf.mxu0 }
 0x16d   : > { %v2132_v19 = vpop.f32.mrf.mxu1  ;;  %v3093_v28 = vpack.c.bf16 %v980_v25, %v980_v25  ;;  %v1270_v21 = vsel %vm1054_vm4, %v1099_v18, 0 }
 0x16e   : > { %v2148_v23 = vpop.f32.mrf.mxu0 }
 0x170   : > { %v901_v30 = vpop.f32.mrf.mxu1 }
 0x171   : > { %v902_v31 = vadd.f32 %v2045_v29, %v901_v30 }
 0x172   : > { %v2139_v32 = vpop.f32.mrf.mxu1 }
 0x173   : > { %v982_v24 = vld [vmem:[#allocation2] sm:$0xf]  ;;  %v910_v33 = vpack.c.bf16 %v902_v31, %v902_v31 }
 0x174   : > { %v997_v26 = vsel %vm992_vm3, %v982_v24, 0  ;;  %v3088_v27 = vcombine.low %v982_v24, %v982_v24  ;;  %v904_v34 = vpop.f32.mrf.mxu1 }
 0x175   : > { %2150 = vmatpush3.bf16.xpose.msra.mxu1 %v997_v26  ;;  %911 = vst.msk [vmem:[#allocation3] sm:$0xf] %vm908_vm2, %v910_v33 }
 0x176   : > { %1106 = vrot.lane.b32.xlu0 %v3088_v27, %s2735_s23  ;;  %2161 = vmatprep.subr.bf16.mxu1 %v2733_v0  ;;  %v2140_v35 = vpop.f32.mrf.mxu1 }
 0x17a   : > { %1101 = vrot.lane.b32.xlu0 %v3093_v28, %s2735_s23 }
 0x17c   : > { %2152 = vmatmul.mubr.msk.bf16.vlgmr.msra.gmra.mxu1 %vm992_vm3, %v3093_v28  ;;  %v983_v36 = vld [vmem:[#allocation3] sm:$0xf] }
 0x17d   : > { %2163 = vmatprep.mubr.msk.bf16.mxu1 %vm2734_vm0, %v2733_v0  ;;  %v1056_v37 = vsel %vm1054_vm4, %v983_v36, 0  ;;  %v3122_v1 = vcombine.low %v983_v36, %v983_v36 }
 0x17e   : > { %2156 = vmatpush3.bf16.msra.mxu0 %v1056_v37 }
 0x17f   : > { %2167 = vmatprep.subr.bf16.mxu0 %v2733_v0 }
 0x1e8   : > { %v1107_v38 = vpop.permute.xlu0 %1106 }
 0x1e9   : > { %v1112_v39 = vsel %vm992_vm3, %v1107_v38, 0 }
 0x1ea   : > { %2162 = vmatpush3.bf16.xpose.msra.mxu1 %v1112_v39 }
 0x1eb   : > { %2173 = vmatprep.subr.bf16.mxu1 %v2733_v0 }
 0x1ec   : > { %v1102_v40 = vpop.permute.xlu0 %1101 }
 0x1f1   : > { %2164 = vmatmul.mubr.msk.bf16.vlgmr.msra.gmra.mxu1 %vm992_vm3, %v1102_v40 }
 0x1f2   : > { %2175 = vmatprep.mubr.msk.bf16.mxu1 %vm2734_vm0, %v2733_v0  ;;  %2174 = vmatpush3.bf16.msra.mxu1 %v1224_v13 }
 0x1f3   : > { %2185 = vmatprep.subr.bf16.mxu1 %v2733_v0 }
 0x23c   : > { %v1033_v47 = vpop.f32.mrf.mxu1 }
 0x23d   : > { %v1034_v48 = vadd.f32 %v1033_v47, %v3115_v46 }
 0x23e   : > { %v2153_v49 = vpop.f32.mrf.mxu1 }
 0x23f   : > { %v1039_v50 = vsel %vm992_vm3, %v1034_v48, -inf }
 0x240   : > { %1040 = vmax.xlane.f32.xlu1 %v1039_v50  ;;  %v1036_v51 = vpop.f32.mrf.mxu1 }
 0x242   : > { %v2154_v52 = vpop.f32.mrf.mxu1 }
 0x2b1   : > { %v1148_v53 = vpop.f32.mrf.mxu1 }
 0x2b2   : > { %v1149_v54 = vadd.f32 %v1148_v53, %v3115_v46 }
 0x2b3   : > { %v2165_v55 = vpop.f32.mrf.mxu1 }
 0x2b4   : > { %v1154_v56 = vsel %vm992_vm3, %v1149_v54, -inf }
 0x2b5   : > { %1155 = vmax.xlane.f32.xlu1 %v1154_v56  ;;  %v1151_v57 = vpop.f32.mrf.mxu1 }
 0x2b7   : > { %v2166_v58 = vpop.f32.mrf.mxu1 }
 0x2c9   : > { %v1041_v59 = vpop.xlane.xlu1 %1040 }
 0x2ca   : > { %v1042_v60 = vsub.f32 %v1034_v48, %v1041_v59 }
 0x2cc   : > { %v1043_v61 = vmul.f32 1.442695, %v1042_v60 }
 0x2ce   : > { %2395 = vpow2.f32 %v1043_v61 }
 0x2db   : > { %v2396_v62 = vpop.eup %2395 }
 0x2dc   : > { %v1045_v63 = vsel %vm992_vm3, %v2396_v62, 0.0 }
 0x2dd   : > { %1046 = vadd.xlane.f32.xlu0 %v1045_v63 }
 0x2f3   : > { %1374 = vrot.lane.b32.xlu0 %v3122_v1, %s2736_s15 }
 0x33e   : > { %v1156_v2 = vpop.xlane.xlu1 %1155 }
 0x33f   : > { %v1157_v3 = vsub.f32 %v1149_v54, %v1156_v2 }
 0x341   : > { %v1158_v4 = vmul.f32 1.442695, %v1157_v3 }
 0x343   : > { %2397 = vpow2.f32 %v1158_v4 }
 0x350   : > { %v2398_v5 = vpop.eup %2397 }
 0x351   : > { %v1160_v7 = vsel %vm992_vm3, %v2398_v5, 0.0 }
 0x352   : > { %1161 = vadd.xlane.f32.xlu1 %v1160_v7 }
 0x363   : > { %1169 = vrot.lane.b32.xlu1 %v3122_v1, %s2735_s23 }
 0x366   : > { %v1047_v8 = vpop.xlane.xlu0 %1046 }
 0x367   : > { %2399 = vrcp.f32 %v1047_v8  ;;  %1314 = vrot.lane.b32.xlu1 %v3088_v27, %s2736_s15 }
 0x36a   : > { %v1375_v22 = vpop.permute.xlu0 %1374 }
 0x36b   : > { %1312 = vrot.lane.b32.xlu1 %v3093_v28, %s2736_s15  ;;  %v1380_v26 = vsel %vm1054_vm4, %v1375_v22, 0  ;;  %s3238_s15 = scalar_lea.hbm %s3357_s17, %s2081_s8 }
 0x374   : > { %v2400_v9 = vpop.eup %2399 }
 0x375   : > { %v1049_v10 = vmul.f32 %v2400_v9, %v2396_v62 }
 0x377   : > { %v1050_v11 = vpack.c.bf16 %v1049_v10, %v1049_v10 }
 0x379   : > { %2158 = vmatmul.mubr.msk.bf16.vlgmr.msra.gmra.mxu0 %vm992_vm3, %v1050_v11 }
 0x37a   : > { %2169 = vmatprep.mubr.msk.bf16.mxu0 %vm2734_vm0, %v2733_v0 }
 0x3db   : > { %v1162_v14 = vpop.xlane.xlu1 %1161 }
 0x3dc   : > { %2401 = vrcp.f32 %v1162_v14 }
 0x3df   : > { %v1170_v15 = vpop.permute.xlu1 %1169 }
 0x3e0   : > { %v1175_v16 = vsel %vm1054_vm4, %v1170_v15, 0 }
 0x3e1   : > { %2168 = vmatpush3.bf16.msra.mxu0 %v1175_v16 }
 0x3e2   : > { %2179 = vmatprep.subr.bf16.mxu0 %v2733_v0 }
 0x3e3   : > { %v1315_v31 = vpop.permute.xlu1 %1314 }
 0x3e4   : > { %v1320_v35 = vsel %vm992_vm3, %v1315_v31, 0 }
 0x3e7   : > { %v1313_v38 = vpop.permute.xlu1 %1312 }
 0x3e9   : > { %v2402_v17 = vpop.eup %2401 }
 0x3ea   : > { %v1164_v19 = vmul.f32 %v2402_v17, %v2398_v5 }
 0x3ec   : > { %v1165_v20 = vpack.c.bf16 %v1164_v19, %v1164_v19 }
 0x3ee   : > { %2170 = vmatmul.mubr.msk.bf16.vlgmr.msra.gmra.mxu0 %vm992_vm3, %v1165_v20 }
 0x3ef   : > { %2180 = vmatpush3.bf16.msra.mxu0 %v1270_v21  ;;  %2181 = vmatprep.mubr.msk.bf16.mxu0 %vm2734_vm0, %v2733_v0 }
 0x3f0   : > { %2191 = vmatprep.subr.bf16.mxu0 %v2733_v0 }
 0x439   : > { %v1092_v23 = vpop.f32.mrf.mxu0 }
 0x43a   : > { %v1098_v24 = vpack.c.bf16 %v1092_v23, %v1092_v23 }
 0x43b   : > { %v2159_v25 = vpop.f32.mrf.mxu0 }
 0x43c   : > { %2182 = vmatmul.mubr.msk.bf16.vlgmr.msra.gmra.mxu0 %vm992_vm3, %v1098_v24  ;;  %v1584_v24 = vld [vmem:[#allocation15 + $0xc] sm:$0xf] }
 0x43d   : > { %2192 = vmatpush3.bf16.msra.mxu0 %v1380_v26  ;;  %v1095_v29 = vpop.f32.mrf.mxu0  ;;  %2193 = vmatprep.mubr.msk.bf16.mxu0 %vm2734_vm0, %v2733_v0  ;;  %v1589_v25 = vsel %vm1054_vm4, %v1584_v24, 0 }
 0x43e   : > { %2203 = vmatprep.subr.bf16.mxu0 %v2733_v0 }
 0x43f   : > { %v2160_v30 = vpop.f32.mrf.mxu0 }
 0x4ae   : > { %v1211_v32 = vpop.f32.mrf.mxu0 }
 0x4af   : > { %v1217_v33 = vpack.c.bf16 %v1211_v32, %v1211_v32 }
 0x4b0   : > { %v2171_v34 = vpop.f32.mrf.mxu0 }
 0x4b1   : > { %2176 = vmatmul.mubr.msk.bf16.vlgmr.msra.gmra.mxu1 %vm992_vm3, %v1217_v33 }
 0x4b2   : > { %2186 = vmatpush3.bf16.xpose.msra.mxu1 %v1320_v35  ;;  %v1214_v36 = vpop.f32.mrf.mxu0  ;;  %2187 = vmatprep.mubr.msk.bf16.mxu1 %vm2734_vm0, %v2733_v0 }
 0x4b3   : > { %2197 = vmatprep.subr.bf16.mxu1 %v2733_v0 }
 0x4b4   : > { %v2172_v37 = vpop.f32.mrf.mxu0 }
 0x4b9   : > { %2188 = vmatmul.mubr.msk.bf16.vlgmr.msra.gmra.mxu1 %vm992_vm3, %v1313_v38 }
 0x4ba   : > { %2199 = vmatprep.mubr.msk.bf16.mxu1 %vm2734_vm0, %v2733_v0 }
 0x4fc   : > { %v3155_v39 = vpop.f32.mrf.mxu0 }
 0x4fe   : > { %v2183_v40 = vpop.f32.mrf.mxu0 }
 0x500   : > { %v1309_v41 = vpop.f32.mrf.mxu0 }
 0x501   : > { %v2067_v41 = vld [vmem:[%s3299_s12] ss:$0 sm:$0xff] }
 0x502   : > { %v2184_v42 = vpop.f32.mrf.mxu0 }
 0x571   : > { %v1260_v43 = vpop.f32.mrf.mxu1 }
 0x572   : > { %v1307_v21 = vadd.f32 %v3155_v39, %v1260_v43 }
 0x573   : > { %v2177_v44 = vpop.f32.mrf.mxu1 }
 0x575   : > { %v1263_v45 = vpop.f32.mrf.mxu1 }
 0x577   : > { %v2178_v47 = vpop.f32.mrf.mxu1 }
 0x579   : > { %v1356_v48 = vpop.f32.mrf.mxu1 }
 0x57a   : > { %v1357_v49 = vadd.f32 %v1356_v48, %v3115_v46 }
 0x57b   : > { %v2189_v50 = vpop.f32.mrf.mxu1 }
 0x57c   : > { %v1362_v51 = vsel %vm992_vm3, %v1357_v49, -inf }
 0x57d   : > { %1363 = vmax.xlane.f32.xlu1 %v1362_v51  ;;  %v1359_v52 = vpop.f32.mrf.mxu1 }
 0x57f   : > { %v2190_v53 = vpop.f32.mrf.mxu1 }
 0x606   : > { %v1364_v54 = vpop.xlane.xlu1 %1363 }
 0x607   : > { %v1365_v55 = vsub.f32 %v1357_v49, %v1364_v54 }
 0x609   : > { %v1366_v56 = vmul.f32 1.442695, %v1365_v55  ;;  %v2389_v55 = vld [vmem:[#allocation16 + $0x8] sm:$0xff]  }
 0x60b   : > { %2403 = vpow2.f32 %v1366_v56  ;;  %v2390_v56 = vld [vmem:[#allocation16] sm:$0xff]  }
 0x618   : > { %v2404_v57 = vpop.eup %2403 }
 0x619   : > { %v1368_v58 = vsel %vm992_vm3, %v2404_v57, 0.0 }
 0x61a   : > { %1369 = vadd.xlane.f32.xlu0 %v1368_v58 }
 0x630   : > { %1474 = vrot.lane.b32.xlu0 %v3088_v27, %s2737_s18 }
 0x634   : > { %1472 = vrot.lane.b32.xlu0 %v3093_v28, %s2737_s18  ;;  %v1424_v28 = vld [vmem:[#allocation15 + $0x8] sm:$0xf] }
 0x635   : > { %v1429_v3 = vsel %vm1054_vm4, %v1424_v28, 0  ;;  %v2391_v28 = vld [vmem:[%s3354_s11 + $0x18] sm:$0xff]  }
 0x636   : > { %2198 = vmatpush3.bf16.msra.mxu1 %v1429_v3  ;;  %v2392_v3 = vld [vmem:[%s3354_s11 + $0x10] sm:$0xff]  }
 0x637   : > { %2209 = vmatprep.subr.bf16.mxu1 %v2733_v0 }
 0x6a3   : > { %v1370_v59 = vpop.xlane.xlu0 %1369 }
 0x6a4   : > { %2405 = vrcp.f32 %v1370_v59 }
 0x6a7   : > { %v1475_v62 = vpop.permute.xlu0 %1474 }
 0x6a8   : > { %v1480_v2 = vsel %vm992_vm3, %v1475_v62, 0  ;;  %v2069_v62 = vld [vmem:[%s3353_s4] ss:$0 sm:$0xff]  ;;  %s3356_s4 = sld [smem:[#allocation39_spill]] }
 0x6ab   : > { %v1473_v27 = vpop.permute.xlu0 %1472 }
 0x6b1   : > { %v2406_v60 = vpop.eup %2405 }
 0x6b2   : > { %v1372_v61 = vmul.f32 %v2406_v60, %v2404_v57  ;;  %v2068_v60 = vld [vmem:[%s3300_s13] ss:$0 sm:$0xff] }
 0x6b4   : > { %v1373_v63 = vpack.c.bf16 %v1372_v61, %v1372_v61 }
 0x6b6   : > { %2194 = vmatmul.mubr.msk.bf16.vlgmr.msra.gmra.mxu0 %vm992_vm3, %v1373_v63 }
 0x6b7   : > { %2204 = vmatpush3.bf16.xpose.msra.mxu0 %v1480_v2  ;;  %2205 = vmatprep.mubr.msk.bf16.mxu0 %vm2734_vm0, %v2733_v0 }
 0x6b8   : > { %2215 = vmatprep.subr.bf16.mxu0 %v2733_v0 }
 0x6be   : > { %2206 = vmatmul.mubr.msk.bf16.vlgmr.msra.gmra.mxu0 %vm992_vm3, %v1473_v27 }
 0x6bf   : > { %2217 = vmatprep.mubr.msk.bf16.mxu0 %vm2734_vm0, %v2733_v0  ;;  %2216 = vmatpush3.bf16.msra.mxu0 %v1589_v25 }
 0x6c0   : > { %2229 = vmatprep.subr.bf16.mxu0 %v2733_v0 }
 0x776   : > { %v1416_v4 = vpop.f32.mrf.mxu0 }
 0x777   : > { %v1422_v5 = vpack.c.bf16 %v1416_v4, %v1416_v4  ;;  %v2393_v4 = vld [vmem:[%s3354_s11 + $0x8] sm:$0xff]  }
 0x778   : > { %v2195_v7 = vpop.f32.mrf.mxu0 }
 0x779   : > { %2200 = vmatmul.mubr.msk.bf16.vlgmr.msra.gmra.mxu1 %vm992_vm3, %v1422_v5  ;;  %v2394_v5 = vld [vmem:[%s3354_s11] sm:$0xff]  }
 0x77a   : > { %v1419_v8 = vpop.f32.mrf.mxu0  ;;  %2211 = vmatprep.mubr.msk.bf16.mxu1 %vm2734_vm0, %v2733_v0  ;;  %v2070_v7 = vld [vmem:[%s3355_s2] ss:$0 sm:$0xff]  ;;  %s2631_s2 = scalar_lea.vmem %s2630_s14, 256 }
 0x77c   : > { %v2196_v9 = vpop.f32.mrf.mxu0 }
 0x77e   : > { %v1516_v10 = vpop.f32.mrf.mxu0 }
 0x77f   : > { %v1517_v11 = vadd.f32 %v1516_v10, %v3115_v46 }
 0x780   : > { %v2207_v12 = vpop.f32.mrf.mxu0 }
 0x781   : > { %v1522_v13 = vsel %vm992_vm3, %v1517_v11, -inf }
 0x782   : > { %1523 = vmax.xlane.f32.xlu0 %v1522_v13  ;;  %v1519_v14 = vpop.f32.mrf.mxu0 }
 0x784   : > { %v2208_v15 = vpop.f32.mrf.mxu0 }
 0x80b   : > { %v1524_v16 = vpop.xlane.xlu0 %1523 }
 0x80c   : > { %v1525_v17 = vsub.f32 %v1517_v11, %v1524_v16 }
 0x80e   : > { %v1526_v18 = vmul.f32 1.442695, %v1525_v17 }
 0x810   : > { %2407 = vpow2.f32 %v1526_v18 }
 0x81d   : > { %v2408_v19 = vpop.eup %2407 }
 0x81e   : > { %v1528_v20 = vsel %vm992_vm3, %v2408_v19, 0.0 }
 0x81f   : > { %1529 = vadd.xlane.f32.xlu1 %v1528_v20 }
 0x830   : > { %1534 = vrot.lane.b32.xlu1 %v3122_v1, %s2737_s18  ;;  %s2625_s18 = scalar_lea.vmem %s3240_s24, 128 }
 0x831   : > { %p2626_p8 = scmp.ne.s32.totalorder %s3240_s24, %s2625_s18  ;;  %p2633_p11 = scmp.lt.s32.totalorder %s2631_s2, %s2625_s18 }
 0x833   : > { %p2627_p7 = pnand %p2626_p8, %p2987_p0  ;;  %p2634_p3 = por %p2633_p11, %p2632_p10 }
 0x835   : > { %p2628_p9 = pneg %p2627_p7 }
 0x837   : > { %p2635_p1 = pnand %p2634_p3, %p2628_p9 }
 0x839   : > { %v1465_v46 = vpop.f32.mrf.mxu1 }
 0x83a   : > { %v1471_v22 = vadd.f32 %v1465_v46, %v1307_v21  ;;  %v2074_v46 = vld [vmem:[%s3356_s4] ss:$0 sm:$0xff] }
 0x83b   : > { %v2201_v23 = vpop.f32.mrf.mxu1 }
 0x83d   : > { %v1468_v26 = vpop.f32.mrf.mxu1 }
 0x83f   : > { %v2202_v29 = vpop.f32.mrf.mxu1 }
 0x8a8   : > { %v1530_v30 = vpop.xlane.xlu1 %1529 }
 0x8a9   : > { %2409 = vrcp.f32 %v1530_v30 }
 0x8ac   : > { %v1535_v31 = vpop.permute.xlu1 %1534 }
 0x8ad   : > { %v1540_v32 = vsel %vm1054_vm4, %v1535_v31, 0 }
 0x8ae   : > { %2210 = vmatpush3.bf16.msra.mxu1 %v1540_v32 }
 0x8af   : > { %2221 = vmatprep.subr.bf16.mxu1 %v2733_v0 }
 0x8b6   : > { %v2410_v1 = vpop.eup %2409 }
 0x8b7   : > { %v1532_v33 = vmul.f32 %v2410_v1, %v2408_v19 }
 0x8b9   : > { %v1533_v34 = vpack.c.bf16 %v1532_v33, %v1532_v33 }
 0x8bb   : > { %2212 = vmatmul.mubr.msk.bf16.vlgmr.msra.gmra.mxu1 %vm992_vm3, %v1533_v34 }
 0x8bc   : > { %2225 = vmatprep.mubr.msk.bf16.mxu1 %vm2734_vm0, %v2733_v0  ;;  %2222 = vmatpush3.bf16.msra.mxu1 %v2389_v55 }
 0x8bd   : > { %2223 = vmatprep.subr.bf16.mxu1 %v2733_v0 }
 0x8c0   : > { %2224 = vmatpush3.bf16.msra.mxu1 %v2390_v56 }
 0x97b   : > { %v1576_v35 = vpop.f32.mrf.mxu1 }
 0x97c   : > { %v1582_v36 = vpack.c.bf16 %v1576_v35, %v1576_v35 }
 0x97d   : > { %v2213_v37 = vpop.f32.mrf.mxu1 }
 0x97e   : > { %2218 = vmatmul.mubr.msk.bf16.vlgmr.msra.gmra.mxu0 %vm992_vm3, %v1582_v36 }
 0x97f   : > { %v1579_v38 = vpop.f32.mrf.mxu1  ;;  %2237 = vmatprep.mubr.msk.bf16.mxu0 %vm2734_vm0, %v2733_v0  ;;  %2230 = vmatpush3.bf16.msra.mxu0 %v2391_v28 }
 0x980   : > { %2231 = vmatprep.subr.bf16.mxu0 %v2733_v0 }
 0x981   : > { %v2214_v39 = vpop.f32.mrf.mxu1 }
 0x983   : > { %2232 = vmatpush3.bf16.msra.mxu0 %v2392_v3 }
 0x984   : > { %2233 = vmatprep.subr.bf16.mxu0 %v2733_v0 }
 0x987   : > { %2234 = vmatpush3.bf16.msra.mxu0 %v2393_v4 }
 0x988   : > { %2235 = vmatprep.subr.bf16.mxu0 %v2733_v0 }
 0x98b   : > { %2236 = vmatpush3.bf16.msra.mxu0 %v2394_v5 }
 0xa3e   : > { %v1625_v40 = vpop.f32.mrf.mxu0 }
 0xa3f   : > { %v1631_v42 = vadd.f32 %v1625_v40, %v1471_v22 }
 0xa40   : > { %v2219_v43 = vpop.f32.mrf.mxu0 }
 0xa41   : > { %v1639_v44 = vadd.f32 %v2067_v41, %v1631_v42 }
 0xa42   : > { %v1628_v45 = vpop.f32.mrf.mxu0 }
 0xa43   : > { %v3197_v47 = vadd.f32 %v1639_v44, %v3062_v6 }
 0xa44   : > { %v2220_v48 = vpop.f32.mrf.mxu0 }
 0xa45   : > { %v1643_v49 = vsel %vm800_vm1, %v3197_v47, 0.0 }
 0xa46   : > { %1644 = vadd.xlane.f32.xlu1 %v1643_v49 }
 0xacf   : > { %v1645_v50 = vpop.xlane.xlu1 %1644 }
 0xad0   : > { %v1647_v51 = vmul.f32 0.03125, %v1645_v50 }
 0xad2   : > { %v1648_v52 = vsub.f32 %v3197_v47, %v1647_v51 }
 0xad4   : > { %v1649_v53 = vmul.f32 %v1648_v52, %v1648_v52 }
 0xad6   : > { %v1650_v54 = vsel %vm800_vm1, %v1649_v53, 0.0 }
 0xad7   : > { %1651 = vadd.xlane.f32.xlu0 %v1650_v54 }
 0xb60   : > { %v1652_v6 = vpop.xlane.xlu0 %1651 }
 0xb61   : > { %v1653_v57 = vmul.f32 0.03125, %v1652_v6 }
 0xb63   : > { %v1654_v58 = vadd.f32 1e-06, %v1653_v57 }
 0xb65   : > { %2411 = vrsqrt.f32 %v1654_v58 }
 0xb72   : > { %v2412_v59 = vpop.eup %2411 }
 0xb73   : > { %v1656_v61 = vmul.f32 %v2412_v59, %v1648_v52 }
 0xb75   : > { %v1663_v63 = vmul.f32 %v2068_v60, %v1656_v61 }
 0xb77   : > { %v1670_v2 = vadd.f32 %v2069_v62, %v1663_v63 }
 0xb79   : > { %v1671_v27 = vpack.c.bf16 %v1670_v2, %v1670_v2 }
 0xb7b   : > { %2226 = vmatmul.mubr.msk.bf16.vlgmr.msra.gmra.mxu1 %vm800_vm1, %v1671_v27 }
 0xc3b   : > { %v1732_v8 = vpop.f32.mrf.mxu1 }
 0xc3c   : > { %v1733_v9 = vadd.f32 %v2070_v7, %v1732_v8 }
 0xc3d   : > { %v2227_v10 = vpop.f32.mrf.mxu1 }
 0xc3e   : > { %v1739_v11 = vmul.f32 %v1733_v9, %v1733_v9  ;;  %v1738_v18 = vmul.f32 0.5, %v1733_v9 }
 0xc3f   : > { %v1735_v12 = vpop.f32.mrf.mxu1 }
 0xc40   : > { %v1740_v13 = vmul.f32 %v1739_v11, %v1733_v9 }
 0xc41   : > { %v2228_v14 = vpop.f32.mrf.mxu1 }
 0xc42   : > { %v1741_v15 = vmul.f32 0.044715, %v1740_v13 }
 0xc44   : > { %v1742_v0 = vadd.f32 %v1741_v15, %v1733_v9 }
 0xc46   : > { %v1743_v16 = vmul.f32 0.7978846, %v1742_v0 }
 0xc48   : > { %2413 = vtanh.f32 %v1743_v16 }
 0xc55   : > { %v2414_v17 = vpop.eup %2413 }
 0xc56   : > { %v1745_v19 = vadd.f32 1.0, %v2414_v17 }
 0xc58   : > { %v1746_v20 = vmul.f32 %v1745_v19, %v1738_v18 }
 0xc5a   : > { %v1747_v21 = vpack.c.bf16 %v1746_v20, %v1746_v20 }
 0xc5c   : > { %2238 = vmatmul.mubr.msk.bf16.vlgmr.msra.gmra.mxu0 %vm1787_vm6, %v1747_v21 }
 0xd1c   : > { %v1825_v22 = vpop.f32.mrf.mxu0 }
 0xd1d   : > { %v1826_v23 = vadd.f32 %v2074_v46, %v1825_v22 }
 0xd1e   : > { %v2239_v24 = vpop.f32.mrf.mxu0 }
 0xd1f   : > { %v1831_v25 = vadd.f32 %v1826_v23, %v3197_v47 }
 0xd20   : > { %v1828_v26 = vpop.f32.mrf.mxu0 }
 0xd21   : > { %1832 = vst.msk [vmem:[%s756_s6] sm:$0xff] %vm800_vm1, %v1831_v25 }
 0xd22   : > { %v2240_v29 = vpop.f32.mrf.mxu0 }
 0xd23   : > { %2638 = shalt.err (!%p2635_p1)
}
 0xd24   : > { %s2639_s3 = scalar_lea.hbm %s3238_s15, 128  ;;  %s2643_s16 = scalar_lea.hbm %s3357_s17, 256 }
 0xd25   : > { %p2640_p4 = scmp.ne.s32.totalorder %s3238_s15, %s2639_s3  ;;  %p2644_p2 = scmp.lt.s32.totalorder %s3238_s15, %s3357_s17 }
 0xd26   : > { %p2645_p6 = scmp.lt.s32.totalorder %s2643_s16, %s2639_s3 }
 0xd27   : > { %p2641_p13 = pnand %p2640_p4, %p2987_p0 }
 0xd28   : > { %p2646_p8 = por %p2645_p6, %p2644_p2 }
 0xd29   : > { %p2642_p12 = pneg %p2641_p13 }
 0xd2b   : > { %p2647_p7 = pnand %p2646_p8, %p2642_p12 }
 0xd2d   : > { %2650 = shalt.err (!%p2647_p7)
}
 0xd2e   : > { %2271 = dma.vmem_to_hbm [thread:$0]  (%p2987_p0), %s3240_s24, 128, %s3238_s15, %s1834_s21  }
 0xd2f PF: > { %s1860_s6 = sand.u32 1, %s2701_s0   ;;  %p3358_p9 = scmp.ge.s32.totalorder %s2721_s22, 2 }
 0xd30   : > { %s1861_s23 = scalar_lea.sflag [#allocation6], %s1860_s6 }
 0xd31   : > { %p2300_p10 = pnand %p3358_p9, %p2995_p5 }
 0xd33   : > { %p2301_p11 = pneg %p2300_p10 }
 0xd35   : > { %2696 = dma.done.wait (%p2301_p11), %s1861_s23, 128  }
 0xd36   : > { %2698 = vsyncadd (%p2301_p11), %s1861_s23, 4294967168  ;;  %s39_s22 = sadd.s32 1, %s2721_s22   ;;  %s3359_s19 = sld [smem:[#allocation25_spill]] }
 0xd37   : > { %p36_p3 = scmp.ge.s32.totalorder %s39_s22, 4   ;;  %s3360_s0 = smov %s2705_s30 }
 0xd38   : > { %s3361_s30 = smov %s2709_s20  ;;  %s3362_s20 = smov %s2993_s27 }
 0xd39   : > { %s3363_s21 = smov %s2717_s1  ;;  %38 = sbr.rel (!%p36_p3) target bundleno = 26 (0x1a), region = 182 }
 0xd3c   : > { %s3364_s1 = smov %s3359_s19 }
 0xd3e   :  { %1866 = vsyncpa [#allocation5], 1 }
 0xd3f   :  { %1868 = vsyncpa [#allocation5 + $0x1], 1 }
 0xd40   :  { %1869 = vsyncpa [#allocation8], 1 }
 0xd41   :  { %1870 = vsyncpa [#allocation11], 1 }
 0xd42   :  { %1871 = vsyncpa [#allocation14], 1 }
 0xd43   :  { %1872 = vsyncpa [#allocation17], 1 }
 0xd44   :  { %1873 = vsyncpa [#allocation6], 1 }
 0xd45   :  { %1875 = vsyncpa [#allocation6 + $0x1], 1 }

</bundles_post_ra>
